<compile_context>
chip_gen: v7x
topology: tpu7x:2x2x1
jax: 0.10.0
libtpu: 0.0.40
codegen_flags: <defaults>
</compile_context>

<pallas_src>
from functools import partial

import jax
import jax.numpy as jnp
from jax.experimental import pallas as pl
from jax.experimental.pallas import tpu as pltpu


def class_attention_kernel(cls_ref, patch_ref, wq_ref, bq_ref, wk_ref, bk_ref,
                           wv_ref, bv_ref, wp_ref, bp_ref, hsel_ref, hexp_ref,
                           o_ref, *, tb, n, num_heads, head_dim):
    C = num_heads * head_dim
    f32 = jnp.float32
    bf16 = jnp.bfloat16

    cls_tok = cls_ref[...]                       # [TB, C]    bf16
    patch = patch_ref[...]                       # [TB*N, C]  bf16

    # --- projections: bf16 MXU operands, f32 accumulation ---------------------
    # scale is already folded into wq / bq (wrapper), so q == q_pt * scale.
    q = jnp.dot(cls_tok, wq_ref[...], preferred_element_type=f32) + bq_ref[...]   # [TB, C] f32
    k = (jnp.dot(patch, wk_ref[...], preferred_element_type=f32)
         + bk_ref[...]).astype(bf16)                                              # [TB*N, C] bf16
    v = (jnp.dot(patch, wv_ref[...], preferred_element_type=f32)
         + bv_ref[...]).astype(bf16)                                              # [TB*N, C] bf16

    k3 = k.reshape(tb, n, C)                                                      # [TB, N, C]
    v3 = v.reshape(tb, n, C)                                                      # [TB, N, C]

    # --- per-head scores, no head loop ----------------------------------------
    # qk[b, n, c] = q[b, c] * k[b, n, c]; reducing the lanes of each head group
    # with the constant 0/1 selection matrix gives s[b, n, h] = q_h . k_{b,n,h}.
    qk = q.astype(bf16).reshape(tb, 1, C) * k3                                    # [TB, N, C] bf16 (VPU)
    s = jnp.dot(qk.reshape(tb * n, C), hsel_ref[...],
                preferred_element_type=f32)                                       # [TB*N, H] f32
    s = s.reshape(tb, n, num_heads)                                               # [TB, N, H]

    # --- softmax over the patch axis (f32) -------------------------------------
    # TODO(synk): for N not divisible by 8 (e.g. DeiT N=196), pad N to a sublane
    # multiple in the wrapper and mask padded score rows to -inf before exp.
    s = s - jnp.max(s, axis=1, keepdims=True)
    p = jnp.exp(s)
    denom = jnp.sum(p, axis=1, keepdims=True)
    p = p * pl.reciprocal(denom, approx=True)                                     # [TB, N, H] f32

    # --- attn @ v: expand head weights to channels, weight V, reduce over N ----
    # hexp is 0/1 with one hit per output channel, so the bf16 dot is exact copy
    # of p; keep the result + over-N accumulation in f32.
    p_exp = jnp.dot(p.reshape(tb * n, num_heads).astype(bf16), hexp_ref[...],
                    preferred_element_type=f32)                                   # [TB*N, C] f32
    cls_embed = jnp.sum(p_exp.reshape(tb, n, C) * v3, axis=1)                     # [TB, C] f32

    # --- output projection ------------------------------------------------------
    out = jnp.dot(cls_embed.astype(bf16), wp_ref[...],
                  preferred_element_type=f32) + bp_ref[...]                       # [TB, C] f32
    o_ref[...] = out.astype(o_ref.dtype)


def class_attention(x, params, num_heads, *, tb=8):
    """x: [B, 1+N, C] f32.  Returns [B, 1, C] (class-token attention output).

    tb = batch rows per grid step.  For real workloads on v5e/v6e raise tb to
    32-64 (and vmem_limit to ~96 MiB); on v7x keep tb at 16-32 so the per-step
    working set stays well under its 64 MiB physical VMEM with >=2 steps/TC.
    """
    B, N1, C = x.shape
    N = N1 - 1
    head_dim = C // num_heads
    scale = head_dim ** (-0.5)

    assert B % tb == 0, "batch must be divisible by the batch tile"
    assert tb % 8 == 0 or tb == B, "batch tile should be a multiple of 8 (sublanes)"
    assert N % 8 == 0, "N must be a sublane multiple (pad + mask otherwise)"

    bf16 = jnp.bfloat16
    f32 = jnp.float32

    # Split cls / patch tokens in the wrapper (no in-kernel gather); pre-flatten
    # patches so each projection is a single 2-D matmul.  Cast to bf16 here so
    # the HBM->VMEM streams are half-width.
    cls_tok = x[:, 0, :].astype(bf16)                       # [B, C]
    patch = x[:, 1:, :].reshape(B * N, C).astype(bf16)      # [B*N, C]

    # Weight prep: bf16 MXU weights, f32 biases; fold the attention scale into
    # the q projection (free at weight-prep time); split kv into k / v halves.
    wq = (params["wq"] * scale).astype(bf16)                # [C, C]
    bq = (params["bq"].reshape(1, C) * scale).astype(f32)   # [1, C]
    wkv = params["wkv"]
    bkv = params["bkv"].reshape(1, 2 * C)
    wk = wkv[:, :C].astype(bf16)                            # [C, C]
    wv = wkv[:, C:].astype(bf16)                            # [C, C]
    bk = bkv[:, :C].astype(f32)                             # [1, C]
    bv = bkv[:, C:].astype(f32)                             # [1, C]
    wp = params["wp"].astype(bf16)                          # [C, C]
    bp = params["bp"].reshape(1, C).astype(f32)             # [1, C]

    # Constant head bookkeeping matrices (exact in bf16):
    # hsel[c, h] = 1 iff channel c belongs to head h; hexp = hsel^T.
    head_ids = jnp.arange(C, dtype=jnp.int32) // head_dim
    hsel = (head_ids[:, None] == jnp.arange(num_heads, dtype=jnp.int32)[None, :]
            ).astype(bf16)                                  # [C, H]
    hexp = hsel.T                                           # [H, C]

    kernel = partial(class_attention_kernel, tb=tb, n=N,
                     num_heads=num_heads, head_dim=head_dim)

    # Constant-index operands: fetched once, single-buffered (Buffered(1)) so
    # they don't pay the default double-buffer VMEM cost.
    def const_spec(shape):
        return pl.BlockSpec(shape, lambda i: (0, 0), pipeline_mode=pl.Buffered(1))

    grid_spec = pltpu.PrefetchScalarGridSpec(
        num_scalar_prefetch=0,
        grid=(B // tb,),
        in_specs=[
            pl.BlockSpec((tb, C), lambda i: (i, 0)),          # cls tokens (bf16)
            pl.BlockSpec((tb * N, C), lambda i: (i, 0)),      # patch tokens (bf16)
            const_spec((C, C)),                               # wq  (scale folded, bf16)
            const_spec((1, C)),                               # bq  (scaled, f32)
            const_spec((C, C)),                               # wk  (bf16)
            const_spec((1, C)),                               # bk
            const_spec((C, C)),                               # wv  (bf16)
            const_spec((1, C)),                               # bv
            const_spec((C, C)),                               # wproj (bf16)
            const_spec((1, C)),                               # bproj
            const_spec((C, num_heads)),                       # head-select S   (bf16)
            const_spec((num_heads, C)),                       # head-expand S^T (bf16)
        ],
        out_specs=pl.BlockSpec((tb, C), lambda i: (i, 0)),    # lane-dense [TB, C]
    )

    out = pl.pallas_call(
        kernel,
        out_shape=jax.ShapeDtypeStruct((B, C), x.dtype),
        grid_spec=grid_spec,
        compiler_params=pltpu.CompilerParams(
            dimension_semantics=("parallel",),     # batch grid; keep >=2 steps per TC
            vmem_limit_bytes=64 * 1024 * 1024,     # ~96 MiB on v5e/v6e, <=48 MiB live on v7x
        ),
    )(cls_tok, patch, wq, bq, wk, bk, wv, bv, wp, bp, hsel, hexp)

    return out.reshape(B, 1, C)


def ref_forward(x, params, num_heads):
    """Pure-JAX (f32) replica of the PyTorch forward, for verification."""
    B, N1, C = x.shape
    hd = C // num_heads
    scale = hd ** (-0.5)
    cls_tok, patch = x[:, :1, :], x[:, 1:, :]
    N = N1 - 1
    kv = patch @ params["wkv"] + params["bkv"]                  # [B, N, 2C]
    kv = kv.reshape(B, N, 2, num_heads, hd).transpose(2, 0, 3, 1, 4)
    k, v = kv[0], kv[1]                                         # [B, H, N, hd]
    q = (cls_tok @ params["wq"] + params["bq"]).reshape(B, num_heads, 1, hd)
    attn = (q * scale) @ jnp.swapaxes(k, -2, -1)                # [B, H, 1, N]
    attn = jax.nn.softmax(attn, axis=-1)
    cls_embed = (attn @ v).transpose(0, 2, 1, 3).reshape(B, 1, C)
    return cls_embed @ params["wp"] + params["bp"]


def trunc_normal(key, shape, std=0.02):
    # matches timm trunc_normal_(std=0.02): truncation at +/- 2 std
    return std * jax.random.truncated_normal(key, -2.0, 2.0, shape, jnp.float32)


if __name__ == "__main__":
    # Module-consistent small shapes: dim=32, num_heads=4 (head_dim=8),
    # batch=16 (batch-tile 8 -> 2 grid steps), 8 patch tokens + 1 class token.
    B, N, C, H = 16, 8, 32, 4

    key = jax.random.PRNGKey(0)
    kx, kq, kkv, kp = jax.random.split(key, 4)

    x = jax.random.normal(kx, (B, N + 1, C), jnp.float32)

    params = {
        "wq": trunc_normal(kq, (C, C)),
        "bq": jnp.zeros((1, C), jnp.float32),
        "wkv": trunc_normal(kkv, (C, 2 * C)),
        "bkv": jnp.zeros((1, 2 * C), jnp.float32),
        "wp": trunc_normal(kp, (C, C)),
        "bp": jnp.zeros((1, C), jnp.float32),
    }

    out = class_attention(x, params, num_heads=H, tb=8)
    out = jax.block_until_ready(out)

    ref = jax.block_until_ready(ref_forward(x, params, num_heads=H))
    assert out.shape == (B, 1, C)
    # bf16 activations / weights / k-v residency with f32 accumulation and an
    # approx-reciprocal softmax denominator -> loosened tolerance vs the
    # pure-f32 reference (use approx=False + f32 inputs if tighter accuracy
    # is required).
    assert jnp.allclose(out, ref, atol=2e-3, rtol=5e-2), "mismatch vs JAX reference"

    print("KERNEL_OK")
</pallas_src>

<mosaic_0001>
module attributes {stable_mosaic.version = 11 : i64} {
  func.func @class_attention_kernel(%arg0: i32, %arg1: memref<8x32xbf16, #tpu.memory_space<vmem>>, %arg2: memref<64x32xbf16, #tpu.memory_space<vmem>>, %arg3: memref<32x32xbf16, #tpu.memory_space<vmem>>, %arg4: memref<1x32xf32, #tpu.memory_space<vmem>>, %arg5: memref<32x32xbf16, #tpu.memory_space<vmem>>, %arg6: memref<1x32xf32, #tpu.memory_space<vmem>>, %arg7: memref<32x32xbf16, #tpu.memory_space<vmem>>, %arg8: memref<1x32xf32, #tpu.memory_space<vmem>>, %arg9: memref<32x32xbf16, #tpu.memory_space<vmem>>, %arg10: memref<1x32xf32, #tpu.memory_space<vmem>>, %arg11: memref<32x4xbf16, #tpu.memory_space<vmem>>, %arg12: memref<4x32xbf16, #tpu.memory_space<vmem>>, %arg13: memref<8x32xf32, #tpu.memory_space<vmem>>) attributes {dimension_semantics = [#tpu.dimension_semantics<parallel>], iteration_bounds = array<i64: 2>, scalar_prefetch = 0 : i64, scratch_operands = 0 : i64, tpu.core_type = #tpu.core_type<tc>, window_params = [{transform_indices = @transform_0, window_bounds = array<i64: 8, 32>}, {transform_indices = @transform_1, window_bounds = array<i64: 64, 32>}, {pipeline_mode = #tpu.pipeline_mode<synchronous>, transform_indices = @transform_2, window_bounds = array<i64: 32, 32>}, {pipeline_mode = #tpu.pipeline_mode<synchronous>, transform_indices = @transform_3, window_bounds = array<i64: 1, 32>}, {pipeline_mode = #tpu.pipeline_mode<synchronous>, transform_indices = @transform_4, window_bounds = array<i64: 32, 32>}, {pipeline_mode = #tpu.pipeline_mode<synchronous>, transform_indices = @transform_5, window_bounds = array<i64: 1, 32>}, {pipeline_mode = #tpu.pipeline_mode<synchronous>, transform_indices = @transform_6, window_bounds = array<i64: 32, 32>}, {pipeline_mode = #tpu.pipeline_mode<synchronous>, transform_indices = @transform_7, window_bounds = array<i64: 1, 32>}, {pipeline_mode = #tpu.pipeline_mode<synchronous>, transform_indices = @transform_8, window_bounds = array<i64: 32, 32>}, {pipeline_mode = #tpu.pipeline_mode<synchronous>, transform_indices = @transform_9, window_bounds = array<i64: 1, 32>}, {pipeline_mode = #tpu.pipeline_mode<synchronous>, transform_indices = @transform_10, window_bounds = array<i64: 32, 4>}, {pipeline_mode = #tpu.pipeline_mode<synchronous>, transform_indices = @transform_11, window_bounds = array<i64: 4, 32>}, {transform_indices = @transform_12, window_bounds = array<i64: 8, 32>}]} {
    %c0 = arith.constant 0 : index
    %c0_0 = arith.constant 0 : index
    %0 = vector.load %arg1[%c0, %c0_0] : memref<8x32xbf16, #tpu.memory_space<vmem>>, vector<8x32xbf16>
    %c0_1 = arith.constant 0 : index
    %c0_2 = arith.constant 0 : index
    %1 = vector.load %arg2[%c0_1, %c0_2] : memref<64x32xbf16, #tpu.memory_space<vmem>>, vector<64x32xbf16>
    %c0_3 = arith.constant 0 : index
    %c0_4 = arith.constant 0 : index
    %2 = vector.load %arg3[%c0_3, %c0_4] : memref<32x32xbf16, #tpu.memory_space<vmem>>, vector<32x32xbf16>
    %cst = arith.constant dense<0.000000e+00> : vector<8x32xf32>
    %3 = tpu.matmul %0, %2, %cst {dimension_numbers = #tpu.dot_dimension_numbers<[1], [0], [0], [1], [0, 0, 1, 1], [], []>} : vector<8x32xbf16>, vector<32x32xbf16>, vector<8x32xf32> -> vector<8x32xf32>
    %c0_5 = arith.constant 0 : index
    %c0_6 = arith.constant 0 : index
    %4 = vector.load %arg4[%c0_5, %c0_6] : memref<1x32xf32, #tpu.memory_space<vmem>>, vector<1x32xf32>
    %5 = vector.broadcast %4 : vector<1x32xf32> to vector<8x32xf32>
    %6 = arith.addf %3, %5 : vector<8x32xf32>
    %c0_7 = arith.constant 0 : index
    %c0_8 = arith.constant 0 : index
    %7 = vector.load %arg5[%c0_7, %c0_8] : memref<32x32xbf16, #tpu.memory_space<vmem>>, vector<32x32xbf16>
    %cst_9 = arith.constant dense<0.000000e+00> : vector<64x32xf32>
    %8 = tpu.matmul %1, %7, %cst_9 {dimension_numbers = #tpu.dot_dimension_numbers<[1], [0], [0], [1], [0, 0, 1, 1], [], []>} : vector<64x32xbf16>, vector<32x32xbf16>, vector<64x32xf32> -> vector<64x32xf32>
    %c0_10 = arith.constant 0 : index
    %c0_11 = arith.constant 0 : index
    %9 = vector.load %arg6[%c0_10, %c0_11] : memref<1x32xf32, #tpu.memory_space<vmem>>, vector<1x32xf32>
    %10 = vector.broadcast %9 : vector<1x32xf32> to vector<64x32xf32>
    %11 = arith.addf %8, %10 : vector<64x32xf32>
    %12 = arith.truncf %11 : vector<64x32xf32> to vector<64x32xbf16>
    %c0_12 = arith.constant 0 : index
    %c0_13 = arith.constant 0 : index
    %13 = vector.load %arg7[%c0_12, %c0_13] : memref<32x32xbf16, #tpu.memory_space<vmem>>, vector<32x32xbf16>
    %cst_14 = arith.constant dense<0.000000e+00> : vector<64x32xf32>
    %14 = tpu.matmul %1, %13, %cst_14 {dimension_numbers = #tpu.dot_dimension_numbers<[1], [0], [0], [1], [0, 0, 1, 1], [], []>} : vector<64x32xbf16>, vector<32x32xbf16>, vector<64x32xf32> -> vector<64x32xf32>
    %c0_15 = arith.constant 0 : index
    %c0_16 = arith.constant 0 : index
    %15 = vector.load %arg8[%c0_15, %c0_16] : memref<1x32xf32, #tpu.memory_space<vmem>>, vector<1x32xf32>
    %16 = vector.broadcast %15 : vector<1x32xf32> to vector<64x32xf32>
    %17 = arith.addf %14, %16 : vector<64x32xf32>
    %18 = arith.truncf %17 : vector<64x32xf32> to vector<64x32xbf16>
    %19 = vector.shape_cast %12 : vector<64x32xbf16> to vector<8x8x32xbf16>
    %20 = vector.shape_cast %18 : vector<64x32xbf16> to vector<8x8x32xbf16>
    %21 = arith.truncf %6 : vector<8x32xf32> to vector<8x32xbf16>
    %22 = vector.shape_cast %21 : vector<8x32xbf16> to vector<8x1x32xbf16>
    %23 = vector.broadcast %22 : vector<8x1x32xbf16> to vector<8x8x32xbf16>
    %24 = arith.mulf %23, %19 : vector<8x8x32xbf16>
    %25 = vector.shape_cast %24 : vector<8x8x32xbf16> to vector<64x32xbf16>
    %c0_17 = arith.constant 0 : index
    %c0_18 = arith.constant 0 : index
    %26 = vector.load %arg11[%c0_17, %c0_18] : memref<32x4xbf16, #tpu.memory_space<vmem>>, vector<32x4xbf16>
    %cst_19 = arith.constant dense<0.000000e+00> : vector<64x4xf32>
    %27 = tpu.matmul %25, %26, %cst_19 {dimension_numbers = #tpu.dot_dimension_numbers<[1], [0], [0], [1], [0, 0, 1, 1], [], []>} : vector<64x32xbf16>, vector<32x4xbf16>, vector<64x4xf32> -> vector<64x4xf32>
    %28 = vector.shape_cast %27 : vector<64x4xf32> to vector<8x8x4xf32>
    %cst_20 = arith.constant dense<0xFF800000> : vector<8x4xf32>
    %29 = vector.multi_reduction <maximumf>, %28, %cst_20 [1] : vector<8x8x4xf32> to vector<8x4xf32>
    %30 = vector.shape_cast %29 : vector<8x4xf32> to vector<8x1x4xf32>
    %31 = vector.broadcast %30 : vector<8x1x4xf32> to vector<8x8x4xf32>
    %32 = arith.subf %28, %31 : vector<8x8x4xf32>
    %33 = math.exp %32 : vector<8x8x4xf32>
    %cst_21 = arith.constant dense<0.000000e+00> : vector<8x4xf32>
    %34 = vector.multi_reduction <add>, %33, %cst_21 [1] : vector<8x8x4xf32> to vector<8x4xf32>
    %35 = vector.shape_cast %34 : vector<8x4xf32> to vector<8x1x4xf32>
    %36 = tpu.reciprocal %35 {approx = true} : vector<8x1x4xf32> -> vector<8x1x4xf32>
    %37 = vector.broadcast %36 : vector<8x1x4xf32> to vector<8x8x4xf32>
    %38 = arith.mulf %33, %37 : vector<8x8x4xf32>
    %39 = vector.shape_cast %38 : vector<8x8x4xf32> to vector<64x4xf32>
    %40 = arith.truncf %39 : vector<64x4xf32> to vector<64x4xbf16>
    %c0_22 = arith.constant 0 : index
    %c0_23 = arith.constant 0 : index
    %41 = vector.load %arg12[%c0_22, %c0_23] : memref<4x32xbf16, #tpu.memory_space<vmem>>, vector<4x32xbf16>
    %cst_24 = arith.constant dense<0.000000e+00> : vector<64x32xf32>
    %42 = tpu.matmul %40, %41, %cst_24 {dimension_numbers = #tpu.dot_dimension_numbers<[1], [0], [0], [1], [0, 0, 1, 1], [], []>} : vector<64x4xbf16>, vector<4x32xbf16>, vector<64x32xf32> -> vector<64x32xf32>
    %43 = vector.shape_cast %42 : vector<64x32xf32> to vector<8x8x32xf32>
    %44 = arith.extf %20 : vector<8x8x32xbf16> to vector<8x8x32xf32>
    %45 = arith.mulf %43, %44 : vector<8x8x32xf32>
    %cst_25 = arith.constant dense<0.000000e+00> : vector<8x32xf32>
    %46 = vector.multi_reduction <add>, %45, %cst_25 [1] : vector<8x8x32xf32> to vector<8x32xf32>
    %47 = arith.truncf %46 : vector<8x32xf32> to vector<8x32xbf16>
    %c0_26 = arith.constant 0 : index
    %c0_27 = arith.constant 0 : index
    %48 = vector.load %arg9[%c0_26, %c0_27] : memref<32x32xbf16, #tpu.memory_space<vmem>>, vector<32x32xbf16>
    %cst_28 = arith.constant dense<0.000000e+00> : vector<8x32xf32>
    %49 = tpu.matmul %47, %48, %cst_28 {dimension_numbers = #tpu.dot_dimension_numbers<[1], [0], [0], [1], [0, 0, 1, 1], [], []>} : vector<8x32xbf16>, vector<32x32xbf16>, vector<8x32xf32> -> vector<8x32xf32>
    %c0_29 = arith.constant 0 : index
    %c0_30 = arith.constant 0 : index
    %50 = vector.load %arg10[%c0_29, %c0_30] : memref<1x32xf32, #tpu.memory_space<vmem>>, vector<1x32xf32>
    %51 = vector.broadcast %50 : vector<1x32xf32> to vector<8x32xf32>
    %52 = arith.addf %49, %51 : vector<8x32xf32>
    %c0_31 = arith.constant 0 : index
    %c0_32 = arith.constant 0 : index
    %53 = vector.load %arg13[%c0_31, %c0_32] : memref<8x32xf32, #tpu.memory_space<vmem>>, vector<8x32xf32>
    tpu.vector_store %arg13[%c0_31, %c0_32], %52 {strides = array<i32>} : memref<8x32xf32, #tpu.memory_space<vmem>>, vector<8x32xf32>,
    return
  }
  func.func @transform_0(%arg0: i32) -> (i32, i32) {
    %c0_i32 = arith.constant 0 : i32
    %c0_i32_0 = arith.constant 0 : i32
    return %arg0, %c0_i32 : i32, i32
  }
  func.func @transform_1(%arg0: i32) -> (i32, i32) {
    %c0_i32 = arith.constant 0 : i32
    %c0_i32_0 = arith.constant 0 : i32
    return %arg0, %c0_i32 : i32, i32
  }
  func.func @transform_2(%arg0: i32) -> (i32, i32) {
    %c0_i32 = arith.constant 0 : i32
    %c0_i32_0 = arith.constant 0 : i32
    %c0_i32_1 = arith.constant 0 : i32
    return %c0_i32, %c0_i32_0 : i32, i32
  }
  func.func @transform_3(%arg0: i32) -> (i32, i32) {
    %c0_i32 = arith.constant 0 : i32
    %c0_i32_0 = arith.constant 0 : i32
    %c0_i32_1 = arith.constant 0 : i32
    return %c0_i32, %c0_i32_0 : i32, i32
  }
  func.func @transform_4(%arg0: i32) -> (i32, i32) {
    %c0_i32 = arith.constant 0 : i32
    %c0_i32_0 = arith.constant 0 : i32
    %c0_i32_1 = arith.constant 0 : i32
    return %c0_i32, %c0_i32_0 : i32, i32
  }
  func.func @transform_5(%arg0: i32) -> (i32, i32) {
    %c0_i32 = arith.constant 0 : i32
    %c0_i32_0 = arith.constant 0 : i32
    %c0_i32_1 = arith.constant 0 : i32
    return %c0_i32, %c0_i32_0 : i32, i32
  }
  func.func @transform_6(%arg0: i32) -> (i32, i32) {
    %c0_i32 = arith.constant 0 : i32
    %c0_i32_0 = arith.constant 0 : i32
    %c0_i32_1 = arith.constant 0 : i32
    return %c0_i32, %c0_i32_0 : i32, i32
  }
  func.func @transform_7(%arg0: i32) -> (i32, i32) {
    %c0_i32 = arith.constant 0 : i32
    %c0_i32_0 = arith.constant 0 : i32
    %c0_i32_1 = arith.constant 0 : i32
    return %c0_i32, %c0_i32_0 : i32, i32
  }
  func.func @transform_8(%arg0: i32) -> (i32, i32) {
    %c0_i32 = arith.constant 0 : i32
    %c0_i32_0 = arith.constant 0 : i32
    %c0_i32_1 = arith.constant 0 : i32
    return %c0_i32, %c0_i32_0 : i32, i32
  }
  func.func @transform_9(%arg0: i32) -> (i32, i32) {
    %c0_i32 = arith.constant 0 : i32
    %c0_i32_0 = arith.constant 0 : i32
    %c0_i32_1 = arith.constant 0 : i32
    return %c0_i32, %c0_i32_0 : i32, i32
  }
  func.func @transform_10(%arg0: i32) -> (i32, i32) {
    %c0_i32 = arith.constant 0 : i32
    %c0_i32_0 = arith.constant 0 : i32
    %c0_i32_1 = arith.constant 0 : i32
    return %c0_i32, %c0_i32_0 : i32, i32
  }
  func.func @transform_11(%arg0: i32) -> (i32, i32) {
    %c0_i32 = arith.constant 0 : i32
    %c0_i32_0 = arith.constant 0 : i32
    %c0_i32_1 = arith.constant 0 : i32
    return %c0_i32, %c0_i32_0 : i32, i32
  }
  func.func @transform_12(%arg0: i32) -> (i32, i32) {
    %c0_i32 = arith.constant 0 : i32
    %c0_i32_0 = arith.constant 0 : i32
    return %arg0, %c0_i32 : i32, i32
  }
}

</mosaic_0001>

<bundles_post_ra>
// kernel: tpu_custom_call.1
= control target key start
LH: loop header
LB: loop body
LE: loop exit
PB: predicated region body
PF: predicated region fallthrough
CT: control target
= control target key end

     0   :  { %s3341_s0 = inlined_call_operand.hbm [shape: bf16[16,32], index: 0, kind: input, shape index: {}]   ;;  %s3342_s1 = inlined_call_operand.hbm [shape: bf16[128,32], index: 1, kind: input, shape index: {}]   ;;  %s3343_s2 = inlined_call_operand.hbm [shape: bf16[32,32], index: 2, kind: input, shape index: {}]   ;;  %s3344_s3 = inlined_call_operand.hbm [shape: f32[1,32], index: 3, kind: input, shape index: {}]   ;;  %s3345_s4 = inlined_call_operand.hbm [shape: bf16[32,32], index: 4, kind: input, shape index: {}]   ;;  %s3346_s5 = inlined_call_operand.hbm [shape: f32[1,32], index: 5, kind: input, shape index: {}]   ;;  %s3347_s6 = inlined_call_operand.hbm [shape: bf16[32,32], index: 6, kind: input, shape index: {}]   ;;  %s3348_s7 = inlined_call_operand.hbm [shape: f32[1,32], index: 7, kind: input, shape index: {}]   ;;  %s3349_s8 = inlined_call_operand.hbm [shape: bf16[32,32], index: 8, kind: input, shape index: {}]   ;;  %s3350_s9 = inlined_call_operand.hbm [shape: f32[1,32], index: 9, kind: input, shape index: {}]   ;;  %s3351_s10 = inlined_call_operand.hbm [shape: bf16[32,4], index: 10, kind: input, shape index: {}]   ;;  %s3352_s11 = inlined_call_operand.hbm [shape: bf16[4,32], index: 11, kind: input, shape index: {}]   ;;  %s3353_s12 = inlined_call_operand.hbm [shape: f32[16,32], index: 12, kind: output, shape index: {}]  }
   0x1   :  { %3364 = sst [smem:[#allocation33_spill]] %s3341_s0 }
   0x2   :  { %3365 = sst [smem:[#allocation34_spill]] %s3342_s1 }
   0x3   :  { %3366 = sst [smem:[#allocation35_spill]] %s3343_s2 }
   0x4   :  { %3367 = sst [smem:[#allocation36_spill]] %s3344_s3 }
   0x5   :  { %3368 = sst [smem:[#allocation37_spill]] %s3345_s4 }
   0x6   :  { %3369 = sst [smem:[#allocation38_spill]] %s3346_s5 }
   0x7   :  { %3370 = sst [smem:[#allocation39_spill]] %s3347_s6 }
   0x8   :  { %3371 = sst [smem:[#allocation40_spill]] %s3348_s7 }
   0x9   :  { %3372 = sst [smem:[#allocation41_spill]] %s3349_s8 }
   0xa   :  { %3373 = sst [smem:[#allocation42_spill]] %s3353_s12 }
   0xb   :  { %17 = vsyncpa [#allocation3], 0 }
   0xc   :  { %19 = vsyncpa [#allocation3 + $0x1], 0 }
   0xd   :  { %20 = vsyncpa [#allocation6], 0 }
   0xe   :  { %22 = vsyncpa [#allocation6 + $0x1], 0 }
   0xf   :  { %23 = vsyncpa [#allocation9], 0 }
  0x10   :  { %24 = vsyncpa [#allocation12], 0 }
  0x11   :  { %25 = vsyncpa [#allocation15], 0 }
  0x12   :  { %26 = vsyncpa [#allocation18], 0 }
  0x13   :  { %27 = vsyncpa [#allocation21], 0 }
  0x14   :  { %28 = vsyncpa [#allocation4], 0 }
  0x15   :  { %30 = vsyncpa [#allocation4 + $0x1], 0  ;;  %s2751_s21 = smov 0   ;;  %s2753_s22 = smov 0  }
  0x16   :  { %s2755_s23 = smov 0   ;;  %s2757_s24 = smov 0  }
  0x17 LB: > { %s2668_s25 = smov [#allocation7]   ;;  %s2772_s27 = sadd.s32 4294967295, %s2666_s24   ;;  %s2666_s24 = sphi %s2757_s24, %s3417_s24   ;;  %s2662_s23 = sphi %s2755_s23, %s3416_s23   ;;  %s2658_s22 = sphi %s2753_s22, %s3415_s22   ;;  %s2654_s21 = sphi %s2751_s21, %s3414_s21  }
  0x18   : > { %s341_s26 = sshll.u32 %s2668_s25, 4  ;;  %p1825_p0 = scmp.ge.s32.totalorder %s2666_s24, 1  ;;  %s2777_s26 = int_to_ptr.vmem [resolvable:$true] %s341_s26 }
  0x19   : > { %p3360_p1 = scmp.eq.s32.totalorder %s2772_s27, 0  ;;  %p329_p2 = scmp.lt.s32.totalorder %s2666_s24, 3 }
  0x1a   : > { %s2669_s29 = smov [#allocation8]   ;;  %s2670_s14 = smov [#allocation11]  }
  0x1b   : > { %p2779_p3 = pnand %p1825_p0, %p329_p2  ;;  %s355_s30 = sshll.u32 %s2669_s29, 4  ;;  %s2792_s30 = int_to_ptr.vmem [resolvable:$true] %s355_s30 }
  0x1c   : > { %s379_s15 = sshll.u32 %s2670_s14, 4  ;;  %s3377_s2 = sld [smem:[#allocation35_spill]]  ;;  %s2794_s15 = int_to_ptr.vmem [resolvable:$true] %s379_s15 }
  0x1d   : > { %s3374_s28 = scalar_select %p2779_p3, 1, 0 }
  0x1e   : > { %p2075_p5 = pneg %p2779_p3 }
  0x1f   : > { %3375 = sst [smem:[#allocation32_spill]] %s3374_s28 }
  0x20   : > { %p2788_p6 = pnand %p2075_p5, %p3360_p1 }
  0x22   : > { %s2232_s18 = scalar_lea.hbm %s3377_s2, 256  ;;  %p2804_p8 = pneg %p2788_p6 }
  0x23   : > { %p2233_p7 = scmp.ne.s32.totalorder %s3377_s2, %s2232_s18  ;;  %p2239_p11 = scmp.lt.u32.totalorder %s2232_s18, %s3377_s2 }
  0x25   : > { %p2235_p9 = pnand %p2804_p8, %p2233_p7 }
  0x27   : > { %p2236_p10 = pneg %p2235_p9 }
  0x29   : > { %p2241_p12 = pnand %p2239_p11, %p2236_p10 }
  0x2b   : > { %2244 = shalt.err (!%p2241_p12)
}
  0x2c   : > { %s2245_s16 = scalar_lea.vmem %s2777_s26, 256  ;;  %p2253_p5 = scmp.lt.s32.totalorder %s2777_s26, %s2777_s26 }
  0x2d   : > { %p2246_p13 = scmp.ne.s32.totalorder %s2777_s26, %s2245_s16  ;;  %p2254_p4 = scmp.lt.s32.totalorder %s2245_s16, %s2245_s16 }
  0x2f   : > { %p2248_p0 = pnand %p2246_p13, %p2804_p8  ;;  %p2255_p7 = por %p2254_p4, %p2253_p5 }
  0x31   : > { %p2249_p2 = pneg %p2248_p0 }
  0x33   : > { %p2256_p9 = pnand %p2255_p7, %p2249_p2 }
  0x35   : > { %2259 = shalt.err (!%p2256_p9)
}
  0x36   : > { %s3358_s17 = smov 64   ;;  %s3362_s18 = smov 4  }
  0x37   : > { %2078 = dma.hbm_to_vmem [thread:$0]  (!%p2788_p6), %s3377_s2, 256, %s2777_s26, [#allocation6], %s3358_s17, %s3358_s17, %s3362_s18  }
  0x38   : > { %s3379_s3 = sld [smem:[#allocation36_spill]] }
  0x3e   : > { %s2260_s16 = scalar_lea.hbm %s3379_s3, 16 }
  0x3f   : > { %p2261_p4 = scmp.ne.s32.totalorder %s3379_s3, %s2260_s16  ;;  %p2267_p12 = scmp.lt.u32.totalorder %s2260_s16, %s3379_s3 }
  0x41   : > { %p2263_p10 = pnand %p2261_p4, %p2804_p8 }
  0x43   : > { %p2264_p11 = pneg %p2263_p10 }
  0x45   : > { %p2269_p13 = pnand %p2267_p12, %p2264_p11 }
  0x47   : > { %2272 = shalt.err (!%p2269_p13)
}
  0x48   : > { %s2273_s26 = scalar_lea.vmem %s2792_s30, 16  ;;  %s2280_s12 = scalar_lea.vmem %s2792_s30, 32 }
  0x49   : > { %p2274_p0 = scmp.ne.s32.totalorder %s2792_s30, %s2273_s26  ;;  %p2281_p7 = scmp.lt.s32.totalorder %s2792_s30, %s2792_s30 }
  0x4a   : > { %p2282_p9 = scmp.lt.s32.totalorder %s2280_s12, %s2273_s26 }
  0x4b   : > { %p2276_p2 = pnand %p2274_p0, %p2804_p8 }
  0x4c   : > { %p2283_p4 = por %p2282_p9, %p2281_p7 }
  0x4d   : > { %p2277_p5 = pneg %p2276_p2 }
  0x4f   : > { %p2284_p10 = pnand %p2283_p4, %p2277_p5 }
  0x51   : > { %2287 = shalt.err (!%p2284_p10)
}
  0x52   : > { %2081 = dma.hbm_to_vmem [thread:$0]  (!%p2788_p6), %s3379_s3, 16, %s2792_s30, [#allocation9]  }
  0x53   : > { %s3380_s5 = sld [smem:[#allocation38_spill]] }
  0x59   : > { %s2288_s20 = scalar_lea.hbm %s3380_s5, 16 }
  0x5a   : > { %p2289_p11 = scmp.ne.s32.totalorder %s3380_s5, %s2288_s20  ;;  %p2295_p0 = scmp.lt.u32.totalorder %s2288_s20, %s3380_s5 }
  0x5c   : > { %p2291_p12 = pnand %p2289_p11, %p2804_p8 }
  0x5e   : > { %p2292_p13 = pneg %p2291_p12 }
  0x60   : > { %p2297_p2 = pnand %p2295_p0, %p2292_p13 }
  0x62   : > { %2300 = shalt.err (!%p2297_p2)
}
  0x63   : > { %s2301_s30 = scalar_lea.vmem %s2794_s15, 16  ;;  %s2308_s12 = scalar_lea.vmem %s2794_s15, 32 }
  0x64   : > { %p2302_p5 = scmp.ne.s32.totalorder %s2794_s15, %s2301_s30  ;;  %p2309_p4 = scmp.lt.s32.totalorder %s2794_s15, %s2794_s15 }
  0x65   : > { %p2310_p10 = scmp.lt.s32.totalorder %s2308_s12, %s2301_s30 }
  0x66   : > { %p2304_p7 = pnand %p2302_p5, %p2804_p8 }
  0x67   : > { %p2311_p11 = por %p2310_p10, %p2309_p4 }
  0x68   : > { %p2305_p9 = pneg %p2304_p7 }
  0x6a   : > { %p2312_p12 = pnand %p2311_p11, %p2305_p9 }
  0x6c   : > { %2315 = shalt.err (!%p2312_p12)
}
  0x6d   : > { %2087 = dma.hbm_to_vmem [thread:$0]  (!%p2788_p6), %s3380_s5, 16, %s2794_s15, [#allocation12]  }
  0x6e   : > { %s2673_s28 = smov [#allocation14]   ;;  %s2674_s20 = smov [#allocation17]  }
  0x6f   : > { %s403_s19 = sshll.u32 %s2673_s28, 4  ;;  %s427_s29 = sshll.u32 %s2674_s20, 4  ;;  %s404_s19 = int_to_ptr.vmem [resolvable:$true] %s403_s19  ;;  %s428_s29 = int_to_ptr.vmem [resolvable:$true] %s427_s29 }
  0x70   : > { %s3381_s7 = sld [smem:[#allocation40_spill]] }
  0x76   : > { %s2316_s26 = scalar_lea.hbm %s3381_s7, 16 }
  0x77   : > { %p2317_p13 = scmp.ne.s32.totalorder %s3381_s7, %s2316_s26  ;;  %p2323_p5 = scmp.lt.u32.totalorder %s2316_s26, %s3381_s7 }
  0x79   : > { %p2319_p0 = pnand %p2317_p13, %p2804_p8 }
  0x7b   : > { %p2320_p2 = pneg %p2319_p0 }
  0x7d   : > { %p2325_p7 = pnand %p2323_p5, %p2320_p2 }
  0x7f   : > { %2328 = shalt.err (!%p2325_p7)
}
  0x80   : > { %s2329_s15 = scalar_lea.vmem %s404_s19, 16  ;;  %s2336_s1 = scalar_lea.vmem %s404_s19, 32 }
  0x81   : > { %p2330_p9 = scmp.ne.s32.totalorder %s404_s19, %s2329_s15  ;;  %p2337_p11 = scmp.lt.s32.totalorder %s404_s19, %s404_s19 }
  0x82   : > { %p2338_p12 = scmp.lt.s32.totalorder %s2336_s1, %s2329_s15 }
  0x83   : > { %p2332_p4 = pnand %p2330_p9, %p2804_p8 }
  0x84   : > { %p2339_p1 = por %p2338_p12, %p2337_p11 }
  0x85   : > { %p2333_p10 = pneg %p2332_p4 }
  0x87   : > { %p2340_p3 = pnand %p2339_p1, %p2333_p10 }
  0x89   : > { %2343 = shalt.err (!%p2340_p3)
}
  0x8a   : > { %2093 = dma.hbm_to_vmem [thread:$0]  (!%p2788_p6), %s3381_s7, 16, %s404_s19, [#allocation15]  }
  0x8b   : > { %s2344_s16 = scalar_lea.hbm %s3350_s9, 16 }
  0x8c   : > { %p2345_p13 = scmp.ne.s32.totalorder %s3350_s9, %s2344_s16  ;;  %p2351_p3 = scmp.lt.u32.totalorder %s2344_s16, %s3350_s9 }
  0x8e   : > { %p2347_p0 = pnand %p2345_p13, %p2804_p8 }
  0x90   : > { %p2348_p1 = pneg %p2347_p0 }
  0x92   : > { %p2353_p2 = pnand %p2351_p3, %p2348_p1 }
  0x94   : > { %2356 = shalt.err (!%p2353_p2)
}
  0x95   : > { %s2357_s15 = scalar_lea.vmem %s428_s29, 16  ;;  %s2364_s19 = scalar_lea.vmem %s428_s29, 32 }
  0x96   : > { %p2358_p5 = scmp.ne.s32.totalorder %s428_s29, %s2357_s15  ;;  %p2365_p4 = scmp.lt.s32.totalorder %s428_s29, %s428_s29 }
  0x97   : > { %p2366_p10 = scmp.lt.s32.totalorder %s2364_s19, %s2357_s15 }
  0x98   : > { %p2360_p7 = pnand %p2358_p5, %p2804_p8 }
  0x99   : > { %p2367_p11 = por %p2366_p10, %p2365_p4 }
  0x9a   : > { %p2361_p9 = pneg %p2360_p7 }
  0x9c   : > { %p2368_p12 = pnand %p2367_p11, %p2361_p9 }
  0x9e   : > { %2371 = shalt.err (!%p2368_p12)
}
  0x9f   : > { %2099 = dma.hbm_to_vmem [thread:$0]  (!%p2788_p6), %s3350_s9, 16, %s428_s29, [#allocation18]  }
  0xa0   : > { %s2675_s20 = smov [#allocation10]   ;;  %s2676_s14 = smov [#allocation13]  }
  0xa1   : > { %s365_s17 = sshll.u32 %s2675_s20, 4  ;;  %s389_s16 = sshll.u32 %s2676_s14, 4  ;;  %s366_s17 = int_to_ptr.vmem [resolvable:$true] %s365_s17  ;;  %s390_s16 = int_to_ptr.vmem [resolvable:$true] %s389_s16 }
  0xa2   : > { %s3382_s4 = sld [smem:[#allocation37_spill]] }
  0xa8   : > { %s2372_s12 = scalar_lea.hbm %s3382_s4, 256 }
  0xa9   : > { %p2373_p13 = scmp.ne.s32.totalorder %s3382_s4, %s2372_s12  ;;  %p2379_p3 = scmp.lt.u32.totalorder %s2372_s12, %s3382_s4 }
  0xab   : > { %p2375_p0 = pnand %p2373_p13, %p2804_p8 }
  0xad   : > { %p2376_p1 = pneg %p2375_p0 }
  0xaf   : > { %p2381_p2 = pnand %p2379_p3, %p2376_p1 }
  0xb1   : > { %2384 = shalt.err (!%p2381_p2)
}
  0xb2   : > { %s2385_s29 = scalar_lea.vmem %s366_s17, 256  ;;  %p2393_p4 = scmp.lt.s32.totalorder %s366_s17, %s366_s17 }
  0xb3   : > { %p2386_p5 = scmp.ne.s32.totalorder %s366_s17, %s2385_s29  ;;  %p2394_p10 = scmp.lt.s32.totalorder %s2385_s29, %s2385_s29 }
  0xb5   : > { %p2388_p7 = pnand %p2386_p5, %p2804_p8  ;;  %p2395_p11 = por %p2394_p10, %p2393_p4 }
  0xb7   : > { %p2389_p9 = pneg %p2388_p7 }
  0xb9   : > { %p2396_p12 = pnand %p2395_p11, %p2389_p9 }
  0xbb   : > { %2399 = shalt.err (!%p2396_p12)
}
  0xbc   : > { %s3383_s28 = smov 64   ;;  %s3384_s6 = sld [smem:[#allocation39_spill]] }
  0xbd   : > { %2084 = dma.hbm_to_vmem [thread:$0]  (!%p2788_p6), %s3382_s4, 256, %s366_s17, [#allocation9], %s3383_s28, %s3383_s28, %s3362_s18  }
  0xc2   : > { %s2400_s12 = scalar_lea.hbm %s3384_s6, 256 }
  0xc3   : > { %p2401_p13 = scmp.ne.s32.totalorder %s3384_s6, %s2400_s12  ;;  %p2407_p3 = scmp.lt.u32.totalorder %s2400_s12, %s3384_s6 }
  0xc5   : > { %p2403_p0 = pnand %p2401_p13, %p2804_p8 }
  0xc7   : > { %p2404_p1 = pneg %p2403_p0 }
  0xc9   : > { %p2409_p2 = pnand %p2407_p3, %p2404_p1 }
  0xcb   : > { %2412 = shalt.err (!%p2409_p2)
}
  0xcc   : > { %s2413_s29 = scalar_lea.vmem %s390_s16, 256  ;;  %p2421_p4 = scmp.lt.s32.totalorder %s390_s16, %s390_s16 }
  0xcd   : > { %p2414_p5 = scmp.ne.s32.totalorder %s390_s16, %s2413_s29  ;;  %p2422_p10 = scmp.lt.s32.totalorder %s2413_s29, %s2413_s29 }
  0xcf   : > { %p2416_p7 = pnand %p2414_p5, %p2804_p8  ;;  %p2423_p11 = por %p2422_p10, %p2421_p4 }
  0xd1   : > { %p2417_p9 = pneg %p2416_p7 }
  0xd3   : > { %p2424_p12 = pnand %p2423_p11, %p2417_p9 }
  0xd5   : > { %2427 = shalt.err (!%p2424_p12)
}
  0xd6   : > { %2090 = dma.hbm_to_vmem [thread:$0]  (!%p2788_p6), %s3384_s6, 256, %s390_s16, [#allocation12], %s3383_s28, %s3383_s28, %s3362_s18  }
  0xd7   : > { %s2677_s14 = smov [#allocation16]   ;;  %s2678_s30 = smov [#allocation19]  }
  0xd8   : > { %s413_s26 = sshll.u32 %s2677_s14, 4  ;;  %s437_s12 = sshll.u32 %s2678_s30, 4  ;;  %s414_s26 = int_to_ptr.vmem [resolvable:$true] %s413_s26  ;;  %s438_s12 = int_to_ptr.vmem [resolvable:$true] %s437_s12 }
  0xd9   : > { %s3385_s8 = sld [smem:[#allocation41_spill]] }
  0xdf   : > { %s2428_s19 = scalar_lea.hbm %s3385_s8, 256 }
  0xe0   : > { %p2429_p13 = scmp.ne.s32.totalorder %s3385_s8, %s2428_s19  ;;  %p2435_p3 = scmp.lt.u32.totalorder %s2428_s19, %s3385_s8 }
  0xe2   : > { %p2431_p0 = pnand %p2429_p13, %p2804_p8 }
  0xe4   : > { %p2432_p1 = pneg %p2431_p0 }
  0xe6   : > { %p2437_p2 = pnand %p2435_p3, %p2432_p1 }
  0xe8   : > { %2440 = shalt.err (!%p2437_p2)
}
  0xe9   : > { %s2441_s16 = scalar_lea.vmem %s414_s26, 256  ;;  %p2449_p4 = scmp.lt.s32.totalorder %s414_s26, %s414_s26 }
  0xea   : > { %p2442_p5 = scmp.ne.s32.totalorder %s414_s26, %s2441_s16  ;;  %p2450_p10 = scmp.lt.s32.totalorder %s2441_s16, %s2441_s16 }
  0xec   : > { %p2444_p7 = pnand %p2442_p5, %p2804_p8  ;;  %p2451_p11 = por %p2450_p10, %p2449_p4 }
  0xee   : > { %p2445_p9 = pneg %p2444_p7 }
  0xf0   : > { %p2452_p12 = pnand %p2451_p11, %p2445_p9 }
  0xf2   : > { %2455 = shalt.err (!%p2452_p12)
}
  0xf3   : > { %2096 = dma.hbm_to_vmem [thread:$0]  (!%p2788_p6), %s3385_s8, 256, %s414_s26, [#allocation15], %s3383_s28, %s3383_s28, %s3362_s18  }
  0xf4   : > { %s2456_s0 = scalar_lea.hbm %s3351_s10, 256 }
  0xf5   : > { %p2457_p13 = scmp.ne.s32.totalorder %s3351_s10, %s2456_s0  ;;  %p2463_p3 = scmp.lt.u32.totalorder %s2456_s0, %s3351_s10 }
  0xf7   : > { %p2459_p0 = pnand %p2457_p13, %p2804_p8 }
  0xf9   : > { %p2460_p1 = pneg %p2459_p0 }
  0xfb   : > { %p2465_p2 = pnand %p2463_p3, %p2460_p1 }
  0xfd   : > { %2468 = shalt.err (!%p2465_p2)
}
  0xfe   : > { %s2469_s17 = scalar_lea.vmem %s438_s12, 256  ;;  %p2477_p4 = scmp.lt.s32.totalorder %s438_s12, %s438_s12 }
  0xff   : > { %p2470_p5 = scmp.ne.s32.totalorder %s438_s12, %s2469_s17  ;;  %p2478_p10 = scmp.lt.s32.totalorder %s2469_s17, %s2469_s17 }
 0x101   : > { %p2472_p7 = pnand %p2470_p5, %p2804_p8  ;;  %p2479_p11 = por %p2478_p10, %p2477_p4 }
 0x103   : > { %p2473_p9 = pneg %p2472_p7 }
 0x105   : > { %p2480_p12 = pnand %p2479_p11, %p2473_p9 }
 0x107   : > { %2483 = shalt.err (!%p2480_p12)
}
 0x108   : > { %2102 = dma.hbm_to_vmem [thread:$0]  (!%p2788_p6), %s3351_s10, 256, %s438_s12, [#allocation18], %s3383_s28, %s3383_s28, %s3362_s18  }
 0x109   : > { %s2679_s2 = smov [#allocation20]   ;;  %s2484_s0 = scalar_lea.hbm %s3352_s11, 32 }
 0x10a   : > { %s451_s20 = sshll.u32 %s2679_s2, 4  ;;  %p2485_p13 = scmp.ne.s32.totalorder %s3352_s11, %s2484_s0  ;;  %s452_s20 = int_to_ptr.vmem [resolvable:$true] %s451_s20 }
 0x10b   : > { %p2491_p3 = scmp.lt.u32.totalorder %s2484_s0, %s3352_s11 }
 0x10c   : > { %p2487_p0 = pnand %p2485_p13, %p2804_p8 }
 0x10e   : > { %p2488_p1 = pneg %p2487_p0 }
 0x110   : > { %p2493_p2 = pnand %p2491_p3, %p2488_p1 }
 0x112   : > { %2496 = shalt.err (!%p2493_p2)
}
 0x113   : > { %s2497_s12 = scalar_lea.vmem %s452_s20, 32  ;;  %p2505_p4 = scmp.lt.s32.totalorder %s452_s20, %s452_s20 }
 0x114   : > { %p2498_p5 = scmp.ne.s32.totalorder %s452_s20, %s2497_s12  ;;  %p2506_p10 = scmp.lt.s32.totalorder %s2497_s12, %s2497_s12 }
 0x116   : > { %p2500_p7 = pnand %p2498_p5, %p2804_p8  ;;  %p2507_p11 = por %p2506_p10, %p2505_p4 }
 0x118   : > { %p2501_p9 = pneg %p2500_p7 }
 0x11a   : > { %p2508_p12 = pnand %p2507_p11, %p2501_p9 }
 0x11c   : > { %2511 = shalt.err (!%p2508_p12)
}
 0x11d   : > { %2105 = dma.hbm_to_vmem [thread:$0]  (!%p2788_p6), %s3352_s11, 32, %s452_s20, [#allocation21]  }
 0x11e   : > { %s1824_s25 = sadd.s32 4294967294, %s2666_s24   ;;  %s3016_s13 = sadd.s32 1, %s2666_s24  }
 0x11f   : > { %s40_s16 = ssub.s32 %s2666_s24, %s3016_s13  ;;  %s43_s2 = sadd.s32 1, %s2662_s23 }
 0x120   : > { %p41_p8 = scmp.eq.s32.totalorder %s40_s16, 0  ;;  %p50_p13 = scmp.ne.s32.totalorder %s2662_s23, %s2658_s22 }
 0x121   : > { %p51_p0 = scmp.eq.s32.totalorder %s2666_s24, 0  ;;  %p56_p1 = scmp.ne.s32.totalorder %s2658_s22, %s2654_s21 }
 0x122   : > { %s3027_s14 = scalar_select %p41_p8, %s2662_s23, %s43_s2  }
 0x123   : > { %p3029_p3 = por %p51_p0, %p50_p13  ;;  %p3387_p2 = scmp.eq.s32.totalorder %s2772_s27, 0 }
 0x124   : > { %p316_p5 = scmp.eq.s32.totalorder %s2772_s27, 1  ;;  %p322_p7 = scmp.eq.s32.totalorder %s1824_s25, 1 }
 0x125   : > { %p3035_p6 = por %p3387_p2, %p56_p1  ;;  %p2127_p9 = scmp.lt.s32.totalorder %s2666_s24, 2 }
 0x126   : > { %s3042_s0 = sand.u32 1, %s2662_s23   ;;  %p3044_p4 = por %p316_p5, %p50_p13 }
 0x127   : > { %p3048_p10 = por %p322_p7, %p56_p1  ;;  %s1837_s1 = sshll.u32 %s3042_s0, 2 }
 0x128   : > { %s3389_s15 = scalar_select %p3044_p4, 1, 0 }
 0x129   : > { %s3390_s19 = scalar_select %p3048_p10, 1, 0 }
 0x12a   : > { %s1838_s29 = sshll.u32 %s2666_s24, 6  ;;  %s3391_s26 = sld [smem:[#allocation33_spill]] }
 0x12b   : > { %s466_s16 = scalar_lea.vmem [#allocation2], %s1837_s1  ;;  %p3063_p11 = pnand %p2127_p9, %p3029_p3 }
 0x12c   : > { %s473_s2 = sshll.u32 %s466_s16, 4  ;;  %s1839_s3 = sshll.u32 %s3042_s0, 5  ;;  %s3059_s2 = int_to_ptr.vmem [resolvable:$true] %s473_s2 }
 0x12d   : > { %s463_s12 = scalar_lea.sflag [#allocation3], %s3042_s0  ;;  %p2514_p8 = pneg %p3063_p11 }
 0x130   : > { %s3057_s25 = scalar_lea.hbm %s3391_s26, %s1838_s29  ;;  %s2517_s30 = scalar_lea.hbm %s3391_s26, 128 }
 0x131   : > { %s2512_s29 = scalar_lea.hbm %s3057_s25, 64  ;;  %p2518_p1 = scmp.lt.u32.totalorder %s3057_s25, %s3391_s26 }
 0x132   : > { %p2513_p12 = scmp.ne.s32.totalorder %s3057_s25, %s2512_s29  ;;  %p2519_p3 = scmp.lt.u32.totalorder %s2517_s30, %s2512_s29 }
 0x133   : > { %p2521_p5 = scmp.lt.u32.totalorder %s2512_s29, %s3057_s25 }
 0x134   : > { %p2515_p13 = pnand %p2514_p8, %p2513_p12  ;;  %p2520_p2 = por %p2519_p3, %p2518_p1 }
 0x136   : > { %p2516_p0 = pneg %p2515_p13  ;;  %p2522_p7 = por %p2521_p5, %p2520_p2 }
 0x138   : > { %p2523_p9 = pnand %p2522_p7, %p2516_p0 }
 0x13a   : > { %2526 = shalt.err (!%p2523_p9)
}
 0x13b   : > { %s2527_s4 = scalar_lea.vmem %s3059_s2, 64  ;;  %s2680_s1 = smov [#allocation2]  }
 0x13c   : > { %p2528_p12 = scmp.ne.s32.totalorder %s3059_s2, %s2527_s4  ;;  %s2532_s17 = sshll.u32 %s2680_s1, 4  ;;  %s2533_s17 = int_to_ptr.vmem [resolvable:$false] %s2532_s17 }
 0x13d   : > { %s2534_s5 = scalar_lea.vmem %s2533_s17, 128  ;;  %p2535_p4 = scmp.lt.s32.totalorder %s3059_s2, %s2533_s17 }
 0x13e   : > { %p2530_p13 = pnand %p2528_p12, %p2514_p8  ;;  %p2536_p1 = scmp.lt.s32.totalorder %s2534_s5, %s2527_s4 }
 0x140   : > { %p2531_p10 = pneg %p2530_p13  ;;  %p2537_p3 = por %p2536_p1, %p2535_p4 }
 0x142   : > { %p2538_p2 = pnand %p2537_p3, %p2531_p10 }
 0x144   : > { %2541 = shalt.err (!%p2538_p2)
}
 0x145   : > { %2109 = dma.hbm_to_vmem [thread:$0]  (!%p3063_p11), %s3057_s25, 64, %s3059_s2, %s463_s12  }
 0x146   : > { %s484_s29 = scalar_lea.vmem [#allocation5], %s1839_s3  ;;  %s1920_s16 = sshll.u32 %s2666_s24, 9 }
 0x147   : > { %s491_s30 = sshll.u32 %s484_s29, 4  ;;  %s3393_s17 = sld [smem:[#allocation34_spill]]  ;;  %s3097_s30 = int_to_ptr.vmem [resolvable:$true] %s491_s30 }
 0x148   : > { %s3394_s6 = sand.u32 1, %s2666_s24  }
 0x149   : > { %s3107_s7 = scalar_lea.sflag [#allocation6], %s3394_s6 }
 0x14d   : > { %s3103_s5 = scalar_lea.hbm %s3393_s17, %s1920_s16  ;;  %s2547_s25 = scalar_lea.hbm %s3393_s17, 1024 }
 0x14e   : > { %s2542_s8 = scalar_lea.hbm %s3103_s5, 512  ;;  %p2548_p5 = scmp.lt.u32.totalorder %s3103_s5, %s3393_s17 }
 0x14f   : > { %p2543_p4 = scmp.ne.s32.totalorder %s3103_s5, %s2542_s8  ;;  %p2549_p7 = scmp.lt.u32.totalorder %s2547_s25, %s2542_s8 }
 0x150   : > { %p2551_p12 = scmp.lt.u32.totalorder %s2542_s8, %s3103_s5 }
 0x151   : > { %p2545_p10 = pnand %p2543_p4, %p2514_p8  ;;  %p2550_p9 = por %p2549_p7, %p2548_p5 }
 0x153   : > { %p2546_p0 = pneg %p2545_p10  ;;  %p2552_p13 = por %p2551_p12, %p2550_p9 }
 0x155   : > { %p2553_p1 = pnand %p2552_p13, %p2546_p0 }
 0x157   : > { %2556 = shalt.err (!%p2553_p1)
}
 0x158   : > { %s2557_s6 = scalar_lea.vmem %s3097_s30, 512  ;;  %s2681_s29 = smov [#allocation5]  }
 0x159   : > { %p2558_p3 = scmp.ne.s32.totalorder %s3097_s30, %s2557_s6  ;;  %s2562_s16 = sshll.u32 %s2681_s29, 4  ;;  %s2563_s16 = int_to_ptr.vmem [resolvable:$false] %s2562_s16 }
 0x15a   : > { %s2564_s1 = scalar_lea.vmem %s2563_s16, 1024  ;;  %p2565_p10 = scmp.lt.s32.totalorder %s3097_s30, %s2563_s16 }
 0x15b   : > { %p2560_p2 = pnand %p2558_p3, %p2514_p8  ;;  %p2566_p5 = scmp.lt.s32.totalorder %s2564_s1, %s2557_s6 }
 0x15d   : > { %p2561_p4 = pneg %p2560_p2  ;;  %p2567_p7 = por %p2566_p5, %p2565_p10 }
 0x15f   : > { %p2568_p9 = pnand %p2567_p7, %p2561_p4 }
 0x161   : > { %2571 = shalt.err (!%p2568_p9)
}
 0x162   : > { %s3395_s8 = smov 4   ;;  %s3396_s4 = sld [smem:[#allocation32_spill]] }
 0x163   : > { %2112 = dma.hbm_to_vmem [thread:$0]  (!%p3063_p11), %s3103_s5, 512, %s3097_s30, %s3107_s7, %s3383_s28, %s3383_s28, %s3395_s8  }
 0x168   : > { %p3397_p8 = scmp.ne.s32.totalorder %s3396_s4, 0 }
 0x169   : > { %s3139_s3 = sand.u32 (!%p3397_p8), 1, %s2658_s22  }
 0x16a   : > { %503 = sbr.rel (%p3397_p8) target bundleno = 1390 (0x56e), region = 68  ;;  %s1843_s0 = sshll.u32 (!%p3397_p8), %s3139_s3, 2 }
 0x16b   : > { %s506_s25 = scalar_lea.sflag (!%p3397_p8), [#allocation3], %s3139_s3  ;;  %s3143_s2 = scalar_lea.vmem (!%p3397_p8), [#allocation2], %s1843_s0 }
 0x171   : > { %2617 = dma.done.wait (%p3035_p6), %s506_s25, 64  }
 0x172   : > { %2619 = vsyncadd (%p3035_p6), %s506_s25, 4294967232  ;;  %s514_s7 = sand.u32 1, %s2772_s27   ;;  %s1844_s18 = sshll.u32 %s3139_s3, 5 }
 0x173   : > { %s515_s28 = scalar_lea.sflag [#allocation6], %s514_s7  ;;  %s3151_s30 = scalar_lea.vmem [#allocation5], %s1844_s18 }
 0x174   : > { %2621 = dma.done.wait (%p3035_p6), %s515_s28, 512  }
 0x175   : > { %2623 = vsyncadd (%p3035_p6), %s515_s28, 4294966784  ;;  %p3398_p11 = scmp.eq.s32.totalorder %s2772_s27, 0 }
 0x177   : > { %2625 = dma.done.wait (%p3398_p11), [#allocation6], 256   ;;  %p3399_p0 = pmov %p3398_p11 }
 0x179   : > { %2627 = vsyncadd (%p3399_p0), [#allocation6], 4294967040  ;;  %p3400_p12 = pmov %p3399_p0 }
 0x17a   : > { %p3401_p13 = pmov %p3399_p0 }
 0x17b   : > { %2629 = dma.done.wait (%p3400_p12), [#allocation9], 272  }
 0x17c   : > { %2631 = vsyncadd (%p3401_p13), [#allocation9], 4294967024  ;;  %p3402_p1 = pmov %p3399_p0 }
 0x17d   : > { %p3403_p3 = pmov %p3399_p0 }
 0x17e   : > { %2633 = dma.done.wait (%p3402_p1), [#allocation12], 272  }
 0x17f   : > { %2635 = vsyncadd (%p3403_p3), [#allocation12], 4294967024  ;;  %p3404_p6 = pmov %p3399_p0 }
 0x180   : > { %p3405_p2 = pmov %p3399_p0 }
 0x181   : > { %2637 = dma.done.wait (%p3404_p6), [#allocation15], 272  }
 0x182   : > { %2639 = vsyncadd (%p3405_p2), [#allocation15], 4294967024  ;;  %p3406_p4 = pmov %p3399_p0 }
 0x183   : > { %p3407_p10 = pmov %p3399_p0 }
 0x184   : > { %2641 = dma.done.wait (%p3406_p4), [#allocation18], 272  }
 0x185   : > { %2643 = vsyncadd (%p3407_p10), [#allocation18], 4294967024  ;;  %p3408_p5 = pmov %p3399_p0 }
 0x186   : > { %p3409_p7 = pmov %p3399_p0 }
 0x187   : > { %2645 = dma.done.wait (%p3408_p5), [#allocation21], 32  }
 0x188   : > { %2647 = vsyncadd (%p3409_p7), [#allocation21], 4294967264  ;;  %v2682_v0 = vmov 0.0   ;;  %vm2683_vm0 = vmmov 0   ;;  %v2186_v1 = vld [vmem:[#allocation7] sm:$0xff]   ;;  %v2187_v2 = vld [vmem:[#allocation7 + $0x8] sm:$0xff]   ;;  %v959_v14 = vlaneseq }
 0x189   : > { %1966 = vmatprep.subr.bf16.mxu0 %v2682_v0  ;;  %1970 = vmatprep.mubr.msk.bf16.mxu0 %vm2683_vm0, %v2682_v0  ;;  %v2188_v3 = vld [vmem:[#allocation10] sm:$0xff]   ;;  %v2189_v4 = vld [vmem:[#allocation10 + $0x8] sm:$0xff]   ;;  %vm638_vm1 = vcmask 261120   ;;  %v3189_v7 = vld [vmem:[%s3151_s30 + $0x8] sm:$0xff]   ;;  %v2684_v12 = vmov 1966171168  }
 0x18a   : > { %1967 = vmatpush3.bf16.msra.mxu0 %v2186_v1  ;;  %1974 = vmatprep.subr.bf16.mxu1 %v2188_v3  ;;  %v2190_v5 = vld [vmem:[%s3151_s30] sm:$0xff]   ;;  %v606_v6 = vld [vmem:[%s3143_s2] sm:$0xf]  ;;  %v3192_v8 = vld [vmem:[%s3151_s30 + $0x10] sm:$0xff]   ;;  %v957_v13 = vunpack.c.l.s4 %v2684_v12  ;;  %v960_v16 = vshrl.u32 %v959_v14, 7  ;;  %vm1375_vm2 = vcmask 1041408  }
 0x18b   : > { %1968 = vmatprep.subr.bf16.mxu0 %v2682_v0  ;;  %1975 = vmatpush3.bf16.msra.mxu1 %v2188_v3  ;;  %v3201_v9 = vld [vmem:[%s3151_s30 + $0x18] sm:$0xff]   ;;  %v2194_v10 = vld [vmem:[#allocation19] sm:$0xff]   ;;  %v2195_v11 = vld [vmem:[#allocation19 + $0x8] sm:$0xff]   ;;  %vm1205_vm3 = vcmask 31744   ;;  %vm1551_vm4 = vcmask 1041409   ;;  %vm1553_vm5 = vcmask 1042434  }
 0x18c   : > { %1976 = vmatprep.subr.bf16.mxu1 %v2189_v4  ;;  %1978 = vmatprep.mubr.msk.bf16.mxu1 %vm638_vm1, %v2190_v5  ;;  %v958_v15 = vunpack.c.0.s8 %v957_v13  ;;  %v1856_v17 = vld [vmem:[#allocation8] ss:$0 sm:$0xff]  ;;  %v1860_v26 = vld [vmem:[#allocation11] ss:$0 sm:$0xff]  ;;  %v3206_v36 = vsub.s32 0, %v960_v16  ;;  %vm1555_vm6 = vcmask 1043459  }
 0x18d   : > { %vm1557_vm7 = vcmask 1044484   ;;  %vm1559_vm8 = vcmask 1045509   ;;  %vm1561_vm9 = vcmask 1046534   ;;  %vm1563_vm10 = vcmask 1047559   ;;  %s1855_s20 = sshll.u32 %s3139_s3, 3  ;;  %s1917_s5 = sshll.u32 %s2772_s27, 7 }
 0x18e   : > { %1969 = vmatpush3.bf16.msra.mxu0 %v2187_v2  ;;  %v961_v20 = vsub.s32 %v958_v15, %v960_v16  ;;  %s603_s12 = scalar_lea.vmem [#allocation22], %s1855_s20  ;;  %s3410_s1 = sld [smem:[#allocation42_spill]] }
 0x18f   : > { %1977 = vmatpush3.bf16.msra.mxu1 %v2189_v4  ;;  %s1636_s6 = sshll.u32 %s603_s12, 4  ;;  %s1623_s27 = scalar_lea.sflag [#allocation4], %s3139_s3  ;;  %s3298_s6 = int_to_ptr.vmem [resolvable:$true] %s1636_s6 }
 0x190   : > { %1998 = vmatprep.subr.bf16.mxu1 %v2194_v10  ;;  %s2572_s4 = scalar_lea.vmem %s3298_s6, 128  ;;  %p3411_p8 = scmp.ne.s32.totalorder %s3389_s15, 0 }
 0x191   : > { %1971 = vmatmul.mubr.msk.bf16.vlgmr.msra.gmra.mrb[0].mxu0 %vm638_vm1, %v606_v6  ;;  %p2573_p9 = scmp.ne.s32.totalorder %s3298_s6, %s2572_s4  ;;  %s2685_s0 = smov [#allocation22]  }
 0x192   : > { %1990 = vmatprep.mubr.msk.bf16.mxu0 %vm638_vm1, %v2190_v5  ;;  %1979 = vmatmul.mubr.msk.bf16.vlgmr.msra.gmra.mrb[0].mxu1 %vm638_vm1, %v3189_v7  ;;  %s2576_s25 = sshll.u32 %s2685_s0, 4  ;;  %s2577_s25 = int_to_ptr.vmem [resolvable:$false] %s2576_s25 }
 0x193   : > { %1982 = vmatprep.mubr.msk.bf16.mxu1 %vm638_vm1, %v3192_v8  ;;  %1999 = vmatpush3.bf16.msra.mxu1 %v2194_v10  ;;  %p2574_p11 = pnand %p2573_p9, %p3411_p8  ;;  %s2578_s2 = scalar_lea.vmem %s2577_s25, 256 }
 0x194   : > { %2000 = vmatprep.subr.bf16.mxu1 %v2195_v11  ;;  %s3296_s8 = scalar_lea.hbm %s3410_s1, %s1917_s5  ;;  %p2579_p12 = scmp.lt.s32.totalorder %s3298_s6, %s2577_s25 }
 0x195   : > { %p2575_p0 = pneg %p2574_p11  ;;  %p2580_p13 = scmp.lt.s32.totalorder %s2578_s2, %s2572_s4 }
 0x197   : > { %2001 = vmatpush3.bf16.msra.mxu1 %v2195_v11  ;;  %p2581_p1 = por %p2580_p13, %p2579_p12 }
 0x198   : > { %2020 = vmatprep.subr.bf16.mxu1 %v2682_v0 }
 0x199   : > { %p2582_p3 = pnand %p2581_p1, %p2575_p0 }
 0x19a   : > { %1983 = vmatmul.mubr.msk.bf16.gmra.mrb[4].mxu1 %vm638_vm1, %v3201_v9 }
 0x264   : > { %v676_v18 = vpop.f32.mrb[0].mxu0 }
 0x265   : > { %v677_v19 = vadd.f32 %v1856_v17, %v676_v18  ;;  %v1972_v21 = vpop.f32.mrb[1].mxu0  ;;  %v1980_v25 = vpop.f32.mrb[0].mxu1 }
 0x266   : > { %v679_v22 = vpop.f32.mrb[2].mxu0  ;;  %v771_v27 = vpop.f32.mrb[1].mxu1  ;;  %v780_v30 = vadd.f32 %v1980_v25, %v1860_v26 }
 0x267   : > { %v954_v23 = vpack.c.bf16 %v677_v19, %v677_v19  ;;  %v1973_v24 = vpop.f32.mrb[3].mxu0  ;;  %v1981_v29 = vpop.f32.mrb[2].mxu1  ;;  %v772_v31 = vadd.f32 %v1860_v26, %v771_v27 }
 0x268   : > { %v783_v32 = vadd.f32 %v1981_v29, %v1860_v26  ;;  %v774_v33 = vpop.f32.mrb[3].mxu1  ;;  %v1923_v42 = vpack.c.bf16 %v780_v30, %v780_v30 }
 0x269   : > { %v962_v28 = vrot.slane %v954_v23, %v961_v20  ;;  %v775_v37 = vadd.f32 %v1860_v26, %v774_v33  ;;  %v1921_v43 = vpack.c.bf16 %v772_v31, %v772_v31 }
 0x26a   : > { %v1924_v44 = vpack.c.bf16 %v783_v32, %v783_v32 }
 0x26b   : > { %v963_v34 = vcombine.high %v962_v28, %v962_v28  ;;  %v970_v35 = vrot.slane %v962_v28, %v961_v20  ;;  %v1922_v50 = vpack.c.bf16 %v775_v37, %v775_v37 }
 0x26d   : > { %v977_v38 = vrot.slane %v963_v34, %v961_v20  ;;  %v978_v39 = vcombine.high %v970_v35, %v970_v35  ;;  %v981_v40 = vunpack.i.h.s16 %v970_v35  ;;  %v1894_v41 = vpack.i.b16 %v970_v35, %v970_v35  ;;  %v1984_v49 = vpop.f32.mrb[4].mxu1 }
 0x26e   : > { %v796_v51 = vadd.f32 %v1984_v49, %v1860_v26  ;;  %v787_v53 = vpop.f32.mrb[5].mxu1 }
 0x26f   : > { %v1895_v45 = vpack.i.b16 %v977_v38, %v977_v38  ;;  %v999_v46 = vrot.slane %v1894_v41, %v3206_v36  ;;  %v983_v47 = vunpack.i.h.s16 %v977_v38  ;;  %v989_v48 = vpack.i.b16 %v981_v40, %v981_v40  ;;  %v1985_v59 = vpop.f32.mrb[6].mxu1 }
 0x270   : > { %v979_v52 = vcombine.high %v977_v38, %v977_v38  ;;  %v1896_v54 = vpack.i.b16 %v978_v39, %v978_v39  ;;  %v788_v61 = vadd.f32 %v1860_v26, %v787_v53  ;;  %v790_v63 = vpop.f32.mrb[7].mxu1  ;;  %v985_v1 = vunpack.i.h.s16 %v978_v39 }
 0x271   : > { %v1007_v55 = vrot.slane %v1895_v45, %v3206_v36  ;;  %v1029_v56 = vpack.i.b16 %v999_v46, %v999_v46  ;;  %v991_v57 = vpack.i.b16 %v983_v47, %v983_v47  ;;  %v1003_v58 = vrot.slane %v989_v48, %v3206_v36  ;;  %v2196_v46 = vld [vmem:[#allocation13] sm:$0xff]   ;;  %v2197_v47 = vld [vmem:[#allocation13 + $0x8] sm:$0xff]  }
 0x272   : > { %v1897_v60 = vpack.i.b16 %v979_v52, %v979_v52  ;;  %v1015_v62 = vrot.slane %v1896_v54, %v3206_v36  ;;  %v1927_v6 = vpack.c.bf16 %v796_v51, %v796_v51  ;;  %v1925_v11 = vpack.c.bf16 %v788_v61, %v788_v61  ;;  %1986 = vmatprep.subr.bf16.mxu0 %v2196_v46 }
 0x273   : > { %v1043_v2 = vpack.i.b16 %v1007_v55, %v1007_v55  ;;  %v1034_v3 = vrot.slane %v1029_v56, %v3206_v36  ;;  %v1011_v4 = vrot.slane %v991_v57, %v3206_v36  ;;  %v1036_v5 = vpack.i.b16 %v1003_v58, %v1003_v58  ;;  %1987 = vmatpush3.bf16.msra.mxu0 %v2196_v46 }
 0x274   : > { %v1023_v10 = vrot.slane %v1897_v60, %v3206_v36  ;;  %v1057_v12 = vpack.i.b16 %v1015_v62, %v1015_v62  ;;  %v799_v19 = vadd.f32 %v1985_v59, %v1860_v26  ;;  %v987_v20 = vunpack.i.h.s16 %v979_v52  ;;  %1988 = vmatprep.subr.bf16.mxu0 %v2197_v47 }
 0x275   : > { %v1048_v13 = vrot.slane %v1043_v2, %v3206_v36  ;;  %v1084_v14 = vmul.bf16 %v1921_v43, %v1034_v3  ;;  %v1050_v15 = vpack.i.b16 %v1011_v4, %v1011_v4  ;;  %v1041_v16 = vrot.slane %v1036_v5, %v3206_v36 }
 0x276   : > { %v1071_v17 = vpack.i.b16 %v1023_v10, %v1023_v10  ;;  %v1062_v18 = vrot.slane %v1057_v12, %v3206_v36  ;;  %v791_v24 = vadd.f32 %v1860_v26, %v790_v63  ;;  %v995_v28 = vpack.i.b16 %v987_v20, %v987_v20 }
 0x277   : > { %v1086_v21 = vmul.bf16 %v1923_v42, %v1048_v13  ;;  %v1055_v22 = vrot.slane %v1050_v15, %v3206_v36  ;;  %v1085_v23 = vmul.bf16 %v1922_v50, %v1041_v16  ;;  %v993_v29 = vpack.i.b16 %v985_v1, %v985_v1  ;;  %1989 = vmatpush3.bf16.msra.mxu0 %v2197_v47 }
 0x278   : > { %v1076_v25 = vrot.slane %v1071_v17, %v3206_v36  ;;  %v1088_v27 = vmul.bf16 %v1925_v11, %v1062_v18  ;;  %v1027_v33 = vrot.slane %v995_v28, %v3206_v36  ;;  %v1928_v37 = vpack.c.bf16 %v799_v19, %v799_v19 }
 0x279   : > { %v1087_v30 = vmul.bf16 %v1924_v44, %v1055_v22  ;;  %v1898_v31 = vcombine.low %v1084_v14, %v1085_v23  ;;  %v1019_v34 = vrot.slane %v993_v29, %v3206_v36  ;;  %v1926_v39 = vpack.c.bf16 %v791_v24, %v791_v24 }
 0x27a   : > { %v1090_v32 = vmul.bf16 %v1927_v6, %v1076_v25  ;;  %v1078_v38 = vpack.i.b16 %v1027_v33, %v1027_v33  ;;  %1991 = vmatmul.mubr.msk.bf16.vlgmr.msra.gmra.mrb[4].mxu0 %vm638_vm1, %v3189_v7 }
 0x27b   : > { %v1899_v35 = vcombine.low %v1086_v21, %v1087_v30  ;;  %2002 = vmatprep.mubr.msk.bf16.mxu1 %vm638_vm1, %v1898_v31  ;;  %v1064_v40 = vpack.i.b16 %v1019_v34, %v1019_v34  ;;  %1994 = vmatprep.mubr.msk.bf16.mxu0 %vm638_vm1, %v3192_v8 }
 0x27c   : > { %v1083_v26 = vrot.slane %v1078_v38, %v3206_v36 }
 0x27d   : > { %2003 = vmatmul.mubr.msk.bf16.vlgmr.msra.gmra.mrb[8].mxu1 %vm638_vm1, %v1899_v35  ;;  %v1069_v41 = vrot.slane %v1064_v40, %v3206_v36  ;;  %v1362_v36 = vld [vmem:[#allocation20] sm:$0x3] }
 0x27e   : > { %v1091_v42 = vmul.bf16 %v1928_v37, %v1083_v26  ;;  %2028 = vmatprep.subr.msk.bf16.mxu0 %vm1375_vm2, %v1362_v36  ;;  %v1377_v48 = vsel %vm1375_vm2, %v1362_v36, 0 }
 0x27f   : > { %v1089_v43 = vmul.bf16 %v1926_v39, %v1069_v41  ;;  %2011 = vmatpush3.bf16.msra.mxu0 %v1377_v48 }
 0x280   : > { %v1901_v44 = vcombine.low %v1090_v32, %v1091_v42 }
 0x281   : > { %v1900_v45 = vcombine.low %v1088_v27, %v1089_v43 }
 0x282   : > { %1995 = vmatmul.mubr.msk.bf16.gmra.mrb[8].mxu0 %vm638_vm1, %v3201_v9 }
 0x283   : > { %2006 = vmatprep.mubr.msk.bf16.mxu1 %vm638_vm1, %v1900_v45 }
 0x285   : > { %2007 = vmatmul.mubr.msk.bf16.gmra.mrb[12].mxu1 %vm638_vm1, %v1901_v44 }
 0x286   : > { %2024 = vmatprep.mubr.msk.bf16.mxu1 %vm2683_vm0, %v2682_v0 }
 0x350   : > { %v2004_v49 = vpop.f32.mrb[8].mxu1 }
 0x351   : > { %v1220_v50 = vsel %vm1205_vm3, %v2004_v49, -inf  ;;  %v1174_v51 = vpop.f32.mrb[9].mxu1 }
 0x352   : > { %v1221_v52 = vrot.slane %v1220_v50, 4  ;;  %v1206_v53 = vsel %vm1205_vm3, %v1174_v51, -inf  ;;  %v2005_v7 = vpop.f32.mrb[10].mxu1 }
 0x353   : > { %v1207_v54 = vrot.slane %v1206_v53, 4  ;;  %v1227_v8 = vsel %vm1205_vm3, %v2005_v7, -inf  ;;  %v1177_v55 = vpop.f32.mrb[11].mxu1 }
 0x354   : > { %v1222_v56 = vmax.f32 %v1220_v50, %v1221_v52  ;;  %v1228_v57 = vrot.slane %v1227_v8, 4  ;;  %v1213_v9 = vsel %vm1205_vm3, %v1177_v55, -inf }
 0x355   : > { %v1208_v58 = vmax.f32 %v1206_v53, %v1207_v54  ;;  %v1214_v59 = vrot.slane %v1213_v9, 4 }
 0x356   : > { %v1223_v60 = vrot.slane %v1222_v56, 2  ;;  %v1229_v61 = vmax.f32 %v1227_v8, %v1228_v57 }
 0x357   : > { %v1209_v62 = vrot.slane %v1208_v58, 2  ;;  %v1215_v63 = vmax.f32 %v1213_v9, %v1214_v59 }
 0x358   : > { %v1224_v1 = vmax.f32 %v1222_v56, %v1223_v60  ;;  %v1230_v2 = vrot.slane %v1229_v61, 2  ;;  %v2008_v3 = vpop.f32.mrb[12].mxu1 }
 0x359   : > { %v1210_v4 = vmax.f32 %v1208_v58, %v1209_v62  ;;  %v1216_v5 = vrot.slane %v1215_v63, 2  ;;  %v1248_v6 = vsel %vm1205_vm3, %v2008_v3, -inf  ;;  %v1190_v10 = vpop.f32.mrb[13].mxu1 }
 0x35a   : > { %v1225_v11 = vrot.slane %v1224_v1, 1  ;;  %v1231_v12 = vmax.f32 %v1229_v61, %v1230_v2  ;;  %v1249_v13 = vrot.slane %v1248_v6, 4  ;;  %v1234_v14 = vsel %vm1205_vm3, %v1190_v10, -inf  ;;  %v2009_v15 = vpop.f32.mrb[14].mxu1 }
 0x35b   : > { %v1211_v16 = vrot.slane %v1210_v4, 1  ;;  %v1217_v17 = vmax.f32 %v1215_v63, %v1216_v5  ;;  %v1235_v18 = vrot.slane %v1234_v14, 4  ;;  %v1255_v19 = vsel %vm1205_vm3, %v2009_v15, -inf  ;;  %v1193_v20 = vpop.f32.mrb[15].mxu1 }
 0x35c   : > { %v1226_v21 = vmax.f32 %v1224_v1, %v1225_v11  ;;  %v1232_v22 = vrot.slane %v1231_v12, 1  ;;  %v1250_v23 = vmax.f32 %v1248_v6, %v1249_v13  ;;  %v1256_v24 = vrot.slane %v1255_v19, 4 }
 0x35d   : > { %v1212_v25 = vmax.f32 %v1210_v4, %v1211_v16  ;;  %v1218_v27 = vrot.slane %v1217_v17, 1  ;;  %v1236_v28 = vmax.f32 %v1234_v14, %v1235_v18  ;;  %v1241_v29 = vsel %vm1205_vm3, %v1193_v20, -inf }
 0x35e   : > { %v1264_v30 = vsub.f32 %v2004_v49, %v1226_v21  ;;  %v1233_v31 = vmax.f32 %v1231_v12, %v1232_v22  ;;  %v1251_v32 = vrot.slane %v1250_v23, 2  ;;  %v1257_v33 = vmax.f32 %v1255_v19, %v1256_v24 }
 0x35f   : > { %v1262_v34 = vsub.f32 %v1174_v51, %v1212_v25  ;;  %v1219_v35 = vmax.f32 %v1217_v17, %v1218_v27  ;;  %v1237_v37 = vrot.slane %v1236_v28, 2  ;;  %v1242_v38 = vrot.slane %v1241_v29, 4 }
 0x360   : > { %v1274_v39 = vmul.f32 1.442695, %v1264_v30  ;;  %v1265_v40 = vsub.f32 %v2005_v7, %v1233_v31  ;;  %v1252_v26 = vmax.f32 %v1250_v23, %v1251_v32  ;;  %v1258_v41 = vrot.slane %v1257_v33, 2 }
 0x361   : > { %v1270_v42 = vmul.f32 1.442695, %v1262_v34  ;;  %v1263_v43 = vsub.f32 %v1177_v55, %v1219_v35  ;;  %v1238_v44 = vmax.f32 %v1236_v28, %v1237_v37  ;;  %v1243_v45 = vmax.f32 %v1241_v29, %v1242_v38 }
 0x362   : > { %2200 = vpow2.f32 %v1274_v39  ;;  %v1276_v46 = vmul.f32 1.442695, %v1265_v40  ;;  %v1253_v47 = vrot.slane %v1252_v26, 1  ;;  %v1259_v36 = vmax.f32 %v1257_v33, %v1258_v41 }
 0x363   : > { %2202 = vpow2.f32 %v1270_v42  ;;  %v1272_v48 = vmul.f32 1.442695, %v1263_v43  ;;  %v1239_v49 = vrot.slane %v1238_v44, 1  ;;  %v1244_v50 = vrot.slane %v1243_v45, 2 }
 0x364   : > { %2204 = vpow2.f32 %v1276_v46  ;;  %v1254_v51 = vmax.f32 %v1252_v26, %v1253_v47  ;;  %v1260_v52 = vrot.slane %v1259_v36, 1 }
 0x365   : > { %2206 = vpow2.f32 %v1272_v48  ;;  %v1240_v53 = vmax.f32 %v1238_v44, %v1239_v49  ;;  %v1245_v7 = vmax.f32 %v1243_v45, %v1244_v50 }
 0x366   : > { %v1268_v54 = vsub.f32 %v2008_v3, %v1254_v51  ;;  %v1261_v8 = vmax.f32 %v1259_v36, %v1260_v52 }
 0x367   : > { %v1266_v56 = vsub.f32 %v1190_v10, %v1240_v53  ;;  %v1246_v55 = vrot.slane %v1245_v7, 1 }
 0x368   : > { %v1282_v57 = vmul.f32 1.442695, %v1268_v54  ;;  %v1269_v9 = vsub.f32 %v2009_v15, %v1261_v8 }
 0x369   : > { %v1278_v58 = vmul.f32 1.442695, %v1266_v56  ;;  %v1247_v59 = vmax.f32 %v1245_v7, %v1246_v55 }
 0x36a   : > { %2208 = vpow2.f32 %v1282_v57  ;;  %v1284_v60 = vmul.f32 1.442695, %v1269_v9 }
 0x36b   : > { %2210 = vpow2.f32 %v1278_v58  ;;  %v1267_v61 = vsub.f32 %v1193_v20, %v1247_v59 }
 0x36c   : > { %v3244_v62 = vpop.eup %2200  ;;  %2212 = vpow2.f32 %v1284_v60 }
 0x36d   : > { %v3246_v63 = vpop.eup %2202  ;;  %v1300_v1 = vsel %vm1205_vm3, %v3244_v62, 0.0  ;;  %v1280_v2 = vmul.f32 1.442695, %v1267_v61 }
 0x36e   : > { %v3250_v3 = vpop.eup %2204  ;;  %v1301_v4 = vrot.slane %v1300_v1, 4  ;;  %v1286_v5 = vsel %vm1205_vm3, %v3246_v63, 0.0 }
 0x36f   : > { %v3254_v6 = vpop.eup %2206  ;;  %v1287_v10 = vrot.slane %v1286_v5, 4  ;;  %v1307_v11 = vsel %vm1205_vm3, %v3250_v3, 0.0  ;;  %2214 = vpow2.f32 %v1280_v2 }
 0x370   : > { %v1302_v12 = vadd.f32 %v1301_v4, %v1300_v1  ;;  %v1308_v13 = vrot.slane %v1307_v11, 4  ;;  %v1293_v14 = vsel %vm1205_vm3, %v3254_v6, 0.0 }
 0x371   : > { %v1288_v15 = vadd.f32 %v1287_v10, %v1286_v5  ;;  %v1294_v16 = vrot.slane %v1293_v14, 4 }
 0x372   : > { %v1303_v17 = vrot.slane %v1302_v12, 2  ;;  %v1309_v18 = vadd.f32 %v1308_v13, %v1307_v11 }
 0x373   : > { %v1289_v19 = vrot.slane %v1288_v15, 2  ;;  %v1295_v20 = vadd.f32 %v1294_v16, %v1293_v14 }
 0x374   : > { %v3260_v21 = vpop.eup %2208  ;;  %v1304_v22 = vadd.f32 %v1303_v17, %v1302_v12  ;;  %v1310_v23 = vrot.slane %v1309_v18, 2 }
 0x375   : > { %v3262_v24 = vpop.eup %2210  ;;  %v1290_v25 = vadd.f32 %v1289_v19, %v1288_v15  ;;  %v1296_v27 = vrot.slane %v1295_v20, 2  ;;  %v1328_v28 = vsel %vm1205_vm3, %v3260_v21, 0.0 }
 0x376   : > { %v2213_v29 = vpop.eup %2212  ;;  %v1305_v30 = vrot.slane %v1304_v22, 1  ;;  %v1311_v31 = vadd.f32 %v1310_v23, %v1309_v18  ;;  %v1329_v32 = vrot.slane %v1328_v28, 4  ;;  %v1314_v33 = vsel %vm1205_vm3, %v3262_v24, 0.0 }
 0x377   : > { %v1291_v34 = vrot.slane %v1290_v25, 1  ;;  %v1297_v35 = vadd.f32 %v1296_v27, %v1295_v20  ;;  %v1315_v37 = vrot.slane %v1314_v33, 4  ;;  %v1335_v38 = vsel %vm1205_vm3, %v2213_v29, 0.0 }
 0x378   : > { %v1306_v39 = vadd.f32 %v1305_v30, %v1304_v22  ;;  %v1312_v40 = vrot.slane %v1311_v31, 1  ;;  %v1330_v26 = vadd.f32 %v1329_v32, %v1328_v28  ;;  %v1336_v41 = vrot.slane %v1335_v38, 4 }
 0x379   : > { %v2215_v42 = vpop.eup %2214  ;;  %v1292_v43 = vadd.f32 %v1291_v34, %v1290_v25  ;;  %v1298_v44 = vrot.slane %v1297_v35, 1  ;;  %v1316_v45 = vadd.f32 %v1315_v37, %v1314_v33 }
 0x37a   : > { %2216 = vrcp.f32 %v1306_v39  ;;  %v1313_v46 = vadd.f32 %v1312_v40, %v1311_v31  ;;  %v1331_v47 = vrot.slane %v1330_v26, 2  ;;  %v1337_v36 = vadd.f32 %v1336_v41, %v1335_v38 }
 0x37b   : > { %2218 = vrcp.f32 %v1292_v43  ;;  %v1299_v48 = vadd.f32 %v1298_v44, %v1297_v35  ;;  %v1317_v49 = vrot.slane %v1316_v45, 2  ;;  %v1321_v50 = vsel %vm1205_vm3, %v2215_v42, 0.0  ;;  %v2199_v35 = vld [vmem:[#allocation16 + $0x8] sm:$0xff]  }
 0x37c   : > { %2220 = vrcp.f32 %v1313_v46  ;;  %v1332_v51 = vadd.f32 %v1331_v47, %v1330_v26  ;;  %v1338_v52 = vrot.slane %v1337_v36, 2  ;;  %v1322_v53 = vrot.slane %v1321_v50, 4 }
 0x37d   : > { %2222 = vrcp.f32 %v1299_v48  ;;  %v1318_v7 = vadd.f32 %v1317_v49, %v1316_v45 }
 0x37e   : > { %v1333_v54 = vrot.slane %v1332_v51, 1  ;;  %v1339_v8 = vadd.f32 %v1338_v52, %v1337_v36  ;;  %v1323_v56 = vadd.f32 %v1322_v53, %v1321_v50 }
 0x37f   : > { %v1319_v55 = vrot.slane %v1318_v7, 1 }
 0x380   : > { %v1334_v57 = vadd.f32 %v1333_v54, %v1332_v51  ;;  %v1340_v9 = vrot.slane %v1339_v8, 1  ;;  %v1324_v58 = vrot.slane %v1323_v56, 2 }
 0x381   : > { %v1320_v59 = vadd.f32 %v1319_v55, %v1318_v7 }
 0x382   : > { %2224 = vrcp.f32 %v1334_v57  ;;  %v1341_v60 = vadd.f32 %v1340_v9, %v1339_v8  ;;  %v1325_v61 = vadd.f32 %v1324_v58, %v1323_v56 }
 0x384   : > { %v2217_v1 = vpop.eup %2216  ;;  %2226 = vrcp.f32 %v1341_v60  ;;  %v1326_v2 = vrot.slane %v1325_v61, 1 }
 0x385   : > { %v2219_v4 = vpop.eup %2218  ;;  %2228 = vrcp.f32 %v1320_v59  ;;  %v1352_v12 = vmul.f32 %v2217_v1, %v3244_v62 }
 0x386   : > { %v2221_v5 = vpop.eup %2220  ;;  %v1327_v10 = vadd.f32 %v1326_v2, %v1325_v61  ;;  %v1350_v14 = vmul.f32 %v2219_v4, %v3246_v63 }
 0x387   : > { %v2223_v11 = vpop.eup %2222  ;;  %v1353_v13 = vmul.f32 %v2221_v5, %v3250_v3 }
 0x388   : > { %2230 = vrcp.f32 %v1327_v10  ;;  %v1351_v15 = vmul.f32 %v2223_v11, %v3254_v6  ;;  %v1992_v6 = vpop.f32.mrb[4].mxu0 }
 0x389   : > { %v1359_v16 = vpack.c.bf16 %v1353_v13, %v1352_v12  ;;  %v863_v28 = vpop.f32.mrb[5].mxu0 }
 0x38a   : > { %v1358_v17 = vpack.c.bf16 %v1351_v15, %v1350_v14  ;;  %v1993_v30 = vpop.f32.mrb[6].mxu0 }
 0x38b   : > { %v866_v31 = vpop.f32.mrb[7].mxu0 }
 0x38c   : > { %v2225_v18 = vpop.eup %2224  ;;  %2012 = vmatprep.mubr.msk.bf16.mxu0 %vm1205_vm3, %v1358_v17  ;;  %v1996_v32 = vpop.f32.mrb[8].mxu0 }
 0x38d   : > { %2013 = vmatmul.mubr.msk.bf16.vlgmr.msra.gmra.mrb[12].mxu0 %vm1205_vm3, %v1359_v16  ;;  %v1356_v20 = vmul.f32 %v2225_v18, %v3260_v21  ;;  %v879_v33 = vpop.f32.mrb[9].mxu0 }
 0x38e   : > { %v2227_v19 = vpop.eup %2226  ;;  %v1997_v34 = vpop.f32.mrb[10].mxu0 }
 0x38f   : > { %v1357_v22 = vmul.f32 %v2227_v19, %v2213_v29  ;;  %v2229_v23 = vpop.eup %2228  ;;  %v882_v21 = vpop.f32.mrb[11].mxu0  ;;  %v2198_v29 = vld [vmem:[#allocation16] sm:$0xff]  }
 0x390   : > { %v1354_v3 = vmul.f32 %v2229_v23, %v3262_v24  ;;  %2021 = vmatpush3.bf16.msra.mxu1 %v2198_v29  ;;  %v1871_v24 = vld [vmem:[#allocation14] ss:$0 sm:$0xff] }
 0x391   : > { %v1361_v62 = vpack.c.bf16 %v1357_v22, %v1356_v20  ;;  %2022 = vmatprep.subr.bf16.mxu1 %v2682_v0  ;;  %v872_v37 = vadd.f32 %v1992_v6, %v1871_v24  ;;  %v864_v38 = vadd.f32 %v1871_v24, %v863_v28  ;;  %v875_v39 = vadd.f32 %v1993_v30, %v1871_v24 }
 0x392   : > { %v2231_v25 = vpop.eup %2230  ;;  %v867_v40 = vadd.f32 %v1871_v24, %v866_v31  ;;  %v888_v50 = vadd.f32 %v1996_v32, %v1871_v24  ;;  %v880_v52 = vadd.f32 %v1871_v24, %v879_v33  ;;  %v891_v8 = vadd.f32 %v1997_v34, %v1871_v24 }
 0x393   : > { %v1355_v27 = vmul.f32 %v2231_v25, %v2215_v42  ;;  %v1931_v26 = vpack.c.bf16 %v872_v37, %v872_v37  ;;  %v1929_v41 = vpack.c.bf16 %v864_v38, %v864_v38  ;;  %v1932_v42 = vpack.c.bf16 %v875_v39, %v875_v39 }
 0x394   : > { %2023 = vmatpush3.bf16.msra.mxu1 %v2199_v35  ;;  %v1930_v43 = vpack.c.bf16 %v867_v40, %v867_v40  ;;  %v1935_v59 = vpack.c.bf16 %v888_v50, %v888_v50  ;;  %v1933_v2 = vpack.c.bf16 %v880_v52, %v880_v52  ;;  %v883_v4 = vadd.f32 %v1871_v24, %v882_v21 }
 0x395   : > { %v1360_v63 = vpack.c.bf16 %v1355_v27, %v1354_v3  ;;  %v1446_v44 = vunpack.c.l.bf16 %v1931_v26  ;;  %v1444_v45 = vunpack.c.l.bf16 %v1929_v41  ;;  %v1447_v47 = vunpack.c.l.bf16 %v1932_v42 }
 0x396   : > { %v1445_v49 = vunpack.c.l.bf16 %v1930_v43  ;;  %v1936_v11 = vpack.c.bf16 %v891_v8, %v891_v8  ;;  %v1450_v16 = vunpack.c.l.bf16 %v1935_v59  ;;  %v1448_v19 = vunpack.c.l.bf16 %v1933_v2 }
 0x397   : > { %2016 = vmatprep.mubr.msk.bf16.mxu0 %vm1205_vm3, %v1360_v63  ;;  %v1934_v20 = vpack.c.bf16 %v883_v4, %v883_v4 }
 0x398   : > { %2017 = vmatmul.mubr.msk.bf16.gmra.mrb[16].mxu0 %vm1205_vm3, %v1361_v62  ;;  %v1451_v25 = vunpack.c.l.bf16 %v1936_v11 }
 0x399   : > { %v1449_v40 = vunpack.c.l.bf16 %v1934_v20 }
 0x460   : > { %v2014_v46 = vpop.f32.mrb[12].mxu0 }
 0x461   : > { %v1454_v36 = vmul.f32 %v2014_v46, %v1446_v44  ;;  %v1413_v48 = vpop.f32.mrb[13].mxu0 }
 0x462   : > { %v1452_v0 = vmul.f32 %v1444_v45, %v1413_v48  ;;  %v2015_v51 = vpop.f32.mrb[14].mxu0 }
 0x463   : > { %v1474_v53 = vsel %vm638_vm1, %v1454_v36, 0.0  ;;  %v1455_v7 = vmul.f32 %v2015_v51, %v1447_v47  ;;  %v1416_v54 = vpop.f32.mrb[15].mxu0 }
 0x464   : > { %v1475_v56 = vrot.slane %v1474_v53, 4  ;;  %v1460_v55 = vsel %vm638_vm1, %v1452_v0, 0.0  ;;  %v1453_v57 = vmul.f32 %v1445_v49, %v1416_v54 }
 0x465   : > { %v1461_v9 = vrot.slane %v1460_v55, 4  ;;  %v1481_v58 = vsel %vm638_vm1, %v1455_v7, 0.0 }
 0x466   : > { %v1476_v60 = vadd.f32 %v1475_v56, %v1474_v53  ;;  %v1482_v61 = vrot.slane %v1481_v58, 4  ;;  %v1467_v1 = vsel %vm638_vm1, %v1453_v57, 0.0 }
 0x467   : > { %v1462_v5 = vadd.f32 %v1461_v9, %v1460_v55  ;;  %v1468_v10 = vrot.slane %v1467_v1, 4 }
 0x468   : > { %v1477_v12 = vrot.slane %v1476_v60, 2  ;;  %v1483_v13 = vadd.f32 %v1482_v61, %v1481_v58 }
 0x469   : > { %v1463_v14 = vrot.slane %v1462_v5, 2  ;;  %v1469_v15 = vadd.f32 %v1468_v10, %v1467_v1 }
 0x46a   : > { %v1478_v17 = vadd.f32 %v1477_v12, %v1476_v60  ;;  %v1484_v18 = vrot.slane %v1483_v13, 2 }
 0x46b   : > { %v1464_v22 = vadd.f32 %v1463_v14, %v1462_v5  ;;  %v1470_v23 = vrot.slane %v1469_v15, 2  ;;  %v2018_v62 = vpop.f32.mrb[16].mxu0 }
 0x46c   : > { %v1479_v3 = vrot.slane %v1478_v17, 1  ;;  %v1485_v27 = vadd.f32 %v1484_v18, %v1483_v13  ;;  %v1458_v63 = vmul.f32 %v2018_v62, %v1450_v16  ;;  %v1429_v6 = vpop.f32.mrb[17].mxu0 }
 0x46d   : > { %v1465_v28 = vrot.slane %v1464_v22, 1  ;;  %v1471_v30 = vadd.f32 %v1470_v23, %v1469_v15  ;;  %v1456_v31 = vmul.f32 %v1448_v19, %v1429_v6  ;;  %v2019_v32 = vpop.f32.mrb[18].mxu0 }
 0x46e   : > { %v1480_v33 = vadd.f32 %v1479_v3, %v1478_v17  ;;  %v1486_v34 = vrot.slane %v1485_v27, 1  ;;  %v1502_v21 = vsel %vm638_vm1, %v1458_v63, 0.0  ;;  %v1459_v29 = vmul.f32 %v2019_v32, %v1451_v25  ;;  %v1432_v35 = vpop.f32.mrb[19].mxu0 }
 0x46f   : > { %v1466_v24 = vadd.f32 %v1465_v28, %v1464_v22  ;;  %v1472_v37 = vrot.slane %v1471_v30, 1  ;;  %v1503_v38 = vrot.slane %v1502_v21, 4  ;;  %v1488_v39 = vsel %vm638_vm1, %v1456_v31, 0.0  ;;  %v1912_v31 = vld [vmem:[#allocation17] ss:$0 sm:$0xff] }
 0x470   : > { %v1487_v26 = vadd.f32 %v1486_v34, %v1485_v27  ;;  %v1489_v41 = vrot.slane %v1488_v39, 4  ;;  %v1509_v42 = vsel %vm638_vm1, %v1459_v29, 0.0  ;;  %v1518_v47 = vpack.c.bf16 %v1480_v33, %v1480_v33 }
 0x471   : > { %v1516_v43 = vpack.c.bf16 %v1466_v24, %v1466_v24  ;;  %v1473_v44 = vadd.f32 %v1472_v37, %v1471_v30  ;;  %v1504_v45 = vadd.f32 %v1503_v38, %v1502_v21  ;;  %v1510_v46 = vrot.slane %v1509_v42, 4 }
 0x472   : > { %v1490_v36 = vadd.f32 %v1489_v41, %v1488_v39  ;;  %v1457_v48 = vmul.f32 %v1449_v40, %v1432_v35  ;;  %v1519_v49 = vpack.c.bf16 %v1487_v26, %v1487_v26  ;;  %v1545_v57 = vunpack.c.l.b16 %v1518_v47 }
 0x473   : > { %v1517_v50 = vpack.c.bf16 %v1473_v44, %v1473_v44  ;;  %v1505_v0 = vrot.slane %v1504_v45, 2  ;;  %v1511_v51 = vadd.f32 %v1510_v46, %v1509_v42  ;;  %v1543_v52 = vunpack.c.l.b16 %v1516_v43 }
 0x474   : > { %v1491_v53 = vrot.slane %v1490_v36, 2  ;;  %v1495_v7 = vsel %vm638_vm1, %v1457_v48, 0.0  ;;  %v1546_v58 = vunpack.c.l.b16 %v1519_v49 }
 0x475   : > { %v1544_v54 = vunpack.c.l.b16 %v1517_v50  ;;  %v1506_v8 = vadd.f32 %v1505_v0, %v1504_v45  ;;  %v1512_v56 = vrot.slane %v1511_v51, 2  ;;  %v1496_v55 = vrot.slane %v1495_v7, 4 }
 0x476   : > { %v1492_v9 = vadd.f32 %v1491_v53, %v1490_v36 }
 0x477   : > { %v1552_v59 = vsel %vm1551_vm4, %v1544_v54, %v1543_v52  ;;  %v1513_v60 = vadd.f32 %v1512_v56, %v1511_v51  ;;  %v1497_v61 = vadd.f32 %v1496_v55, %v1495_v7  ;;  %v1507_v2 = vrot.slane %v1506_v8, 1 }
 0x478   : > { %v1554_v1 = vsel %vm1553_vm5, %v1545_v57, %v1552_v59  ;;  %v1493_v4 = vrot.slane %v1492_v9, 1 }
 0x479   : > { %v1556_v5 = vsel %vm1555_vm6, %v1546_v58, %v1554_v1  ;;  %v1514_v10 = vrot.slane %v1513_v60, 1  ;;  %v1498_v11 = vrot.slane %v1497_v61, 2  ;;  %v1508_v14 = vadd.f32 %v1507_v2, %v1506_v8 }
 0x47a   : > { %v1494_v12 = vadd.f32 %v1493_v4, %v1492_v9 }
 0x47b   : > { %v1499_v13 = vadd.f32 %v1498_v11, %v1497_v61  ;;  %v1515_v16 = vadd.f32 %v1514_v10, %v1513_v60  ;;  %v1522_v20 = vpack.c.bf16 %v1508_v14, %v1508_v14 }
 0x47c   : > { %v1520_v15 = vpack.c.bf16 %v1494_v12, %v1494_v12 }
 0x47d   : > { %v1500_v17 = vrot.slane %v1499_v13, 1  ;;  %v1523_v23 = vpack.c.bf16 %v1515_v16, %v1515_v16  ;;  %v1549_v3 = vunpack.c.l.b16 %v1522_v20 }
 0x47e   : > { %v1547_v18 = vunpack.c.l.b16 %v1520_v15 }
 0x47f   : > { %v1501_v19 = vadd.f32 %v1500_v17, %v1499_v13  ;;  %v1550_v27 = vunpack.c.l.b16 %v1523_v23 }
 0x480   : > { %v1558_v22 = vsel %vm1557_vm7, %v1547_v18, %v1556_v5 }
 0x481   : > { %v1521_v62 = vpack.c.bf16 %v1501_v19, %v1501_v19 }
 0x483   : > { %v1548_v25 = vunpack.c.l.b16 %v1521_v62 }
 0x485   : > { %v1560_v63 = vsel %vm1559_vm8, %v1548_v25, %v1558_v22 }
 0x486   : > { %v1562_v6 = vsel %vm1561_vm9, %v1549_v3, %v1560_v63 }
 0x487   : > { %v1564_v28 = vsel %vm1563_vm10, %v1550_v27, %v1562_v6 }
 0x488   : > { %v1565_v30 = vpack.c.b16 %v1564_v28, %v1564_v28 }
 0x48a   : > { %2025 = vmatmul.mubr.msk.bf16.vlgmr.msra.gmra.mrb[16].mxu1 %vm638_vm1, %v1565_v30 }
 0x55d   : > { %v1615_v32 = vpop.f32.mrb[16].mxu1 }
 0x55e   : > { %v1616_v33 = vadd.f32 %v1912_v31, %v1615_v32  ;;  %v2026_v34 = vpop.f32.mrb[17].mxu1 }
 0x55f   : > { %v1618_v21 = vpop.f32.mrb[18].mxu1 }
 0x560   : > { %v2027_v29 = vpop.f32.mrb[19].mxu1  ;;  %1621 = vst.msk [vmem:[%s603_s12] sm:$0xff] %vm638_vm1, %v1616_v33 }
 0x561   : > { %2585 = shalt.err (!%p2582_p3)
}
 0x562   : > { %s2586_s3 = scalar_lea.hbm %s3296_s8, 128  ;;  %s2590_s28 = scalar_lea.hbm %s3410_s1, 256 }
 0x563   : > { %p2587_p6 = scmp.ne.s32.totalorder %s3296_s8, %s2586_s3  ;;  %p2591_p10 = scmp.lt.u32.totalorder %s3296_s8, %s3410_s1 }
 0x564   : > { %p2592_p5 = scmp.lt.u32.totalorder %s2590_s28, %s2586_s3  ;;  %p2594_p9 = scmp.lt.u32.totalorder %s2586_s3, %s3296_s8 }
 0x565   : > { %p2588_p2 = pnand %p2587_p6, %p3411_p8 }
 0x566   : > { %p2593_p7 = por %p2592_p5, %p2591_p10 }
 0x567   : > { %p2589_p4 = pneg %p2588_p2 }
 0x568   : > { %p2595_p11 = por %p2594_p9, %p2593_p7 }
 0x56a   : > { %p2596_p0 = pnand %p2595_p11, %p2589_p4 }
 0x56c   : > { %2599 = shalt.err (!%p2596_p0)
}
 0x56d   : > { %2073 = dma.vmem_to_hbm [thread:$0]  (%p3411_p8), %s3298_s6, 128, %s3296_s8, %s1623_s27  }
 0x56e PF: > { %s1648_s5 = sand.u32 1, %s2654_s21   ;;  %p3412_p12 = scmp.ne.s32.totalorder %s3390_s19, 0 }
 0x56f   : > { %p3413_p13 = scmp.ge.s32.totalorder %s2666_s24, 2  ;;  %s1649_s12 = scalar_lea.sflag [#allocation4], %s1648_s5 }
 0x571   : > { %p2114_p1 = pnand %p3413_p13, %p3412_p12 }
 0x573   : > { %2649 = dma.done.wait (!%p2114_p1), %s1649_s12, 128  }
 0x574   : > { %2651 = vsyncadd (!%p2114_p1), %s1649_s12, 4294967168  ;;  %p33_p3 = scmp.ge.s32.totalorder %s3016_s13, 4   ;;  %s3414_s21 = smov %s2658_s22 }
 0x575   : > { %s3415_s22 = smov %s2662_s23  ;;  %s3416_s23 = smov %s3027_s14 }
 0x576   : > { %s3417_s24 = smov %s3016_s13  ;;  %35 = sbr.rel (!%p33_p3) target bundleno = 23 (0x17), region = 166 }
 0x57d   :  { %1654 = vsyncpa [#allocation3], 1 }
 0x57e   :  { %1656 = vsyncpa [#allocation3 + $0x1], 1 }
 0x57f   :  { %1657 = vsyncpa [#allocation6], 1 }
 0x580   :  { %1659 = vsyncpa [#allocation6 + $0x1], 1 }
 0x581   :  { %1660 = vsyncpa [#allocation9], 1 }
 0x582   :  { %1661 = vsyncpa [#allocation12], 1 }
 0x583   :  { %1662 = vsyncpa [#allocation15], 1 }
 0x584   :  { %1663 = vsyncpa [#allocation18], 1 }
 0x585   :  { %1664 = vsyncpa [#allocation21], 1 }
 0x586   :  { %1665 = vsyncpa [#allocation4], 1 }
 0x587   :  { %1667 = vsyncpa [#allocation4 + $0x1], 1 }

</bundles_post_ra>
